<compile_context>
chip_gen: v7x
topology: tpu7x:2x2x1
jax: 0.10.0
libtpu: 0.0.40
codegen_flags: <defaults>
</compile_context>

<pallas_src>
import functools

import jax
import jax.numpy as jnp
from jax import lax
from jax.experimental import pallas as pl
from jax.experimental.pallas import tpu as pltpu


def _round_up(x, m):
    return ((x + m - 1) // m) * m


def encoder_gru_kernel(x_ref, wih_ref, whh_ref, bih_ref, bhh_ref, h0_ref,
                       out_ref, h_scratch, gi_scratch):
    """One sequence CHUNK per grid iteration; hidden carried in VMEM scratch.

    x_ref   : (CHUNK, Hp)  pre-gathered embedding rows for this chunk
    wih_ref : (Hp, 3*Hp)   W_ih^T, per-gate blocks padded to Hp (VMEM-resident)
    whh_ref : (Hp, 3*Hp)   W_hh^T, likewise
    bih_ref : (1, 3*Hp)    b_ih padded
    bhh_ref : (1, 3*Hp)    b_hh padded
    h0_ref  : (1, Hp)      initial hidden
    out_ref : (CHUNK, Hp)  per-step hidden outputs for this chunk
    h_scratch  : (1, Hp)       recurrent hidden accumulator (persists across chunks)
    gi_scratch : (CHUNK, 3*Hp) hoisted input projection for this chunk
    """
    c = pl.program_id(0)
    Hp = h0_ref.shape[1]
    chunk = x_ref.shape[0]

    @pl.when(c == 0)
    def _():
        h_scratch[...] = h0_ref[...]

    # Hoisted input projection: one MXU matmul for all steps of the chunk.
    gi_scratch[...] = (
        jnp.dot(x_ref[...], wih_ref[...], preferred_element_type=jnp.float32)
        + bih_ref[...])

    def step(t, h):
        gi = gi_scratch[pl.ds(t, 1), :]                       # (1, 3Hp)
        gh = (jnp.dot(h, whh_ref[...], preferred_element_type=jnp.float32)
              + bhh_ref[...])                                 # (1, 3Hp)
        # PyTorch GRU gate order: reset, update, new.  Slices are lane-aligned.
        r = jax.nn.sigmoid(gi[:, :Hp] + gh[:, :Hp])
        z = jax.nn.sigmoid(gi[:, Hp:2 * Hp] + gh[:, Hp:2 * Hp])
        n = jnp.tanh(gi[:, 2 * Hp:] + r * gh[:, 2 * Hp:])
        h_new = (1.0 - z) * n + z * h
        out_ref[pl.ds(t, 1), :] = h_new                       # VMEM store only
        return h_new

    # Fully unrolled for small chunks (static indices, LLO visibility).
    h_final = lax.fori_loop(0, chunk, step, h_scratch[...],
                            unroll=(chunk <= 16))
    h_scratch[...] = h_final


def _pad_params(params, Hp):
    """Pad + pre-transpose weights to the lane-dense kernel layout.

    Padded lanes get zero weight columns / zero bias, so padded hidden lanes
    stay exactly zero through the recurrence (gi=gh=0 -> r=z=0.5, n=0,
    h_pad_new = 0.5 * h_pad = 0).
    """
    emb = params["embedding"]
    V, H = emb.shape
    emb_p = jnp.zeros((V, Hp), jnp.float32).at[:, :H].set(emb)

    wih_p = jnp.zeros((Hp, 3 * Hp), jnp.float32)
    whh_p = jnp.zeros((Hp, 3 * Hp), jnp.float32)
    bih_p = jnp.zeros((1, 3 * Hp), jnp.float32)
    bhh_p = jnp.zeros((1, 3 * Hp), jnp.float32)
    for g in range(3):  # gate order r, z, n
        wih_p = wih_p.at[:H, g * Hp:g * Hp + H].set(
            params["w_ih"][g * H:(g + 1) * H, :].T)
        whh_p = whh_p.at[:H, g * Hp:g * Hp + H].set(
            params["w_hh"][g * H:(g + 1) * H, :].T)
        bih_p = bih_p.at[:, g * Hp:g * Hp + H].set(
            params["b_ih"][:, g * H:(g + 1) * H])
        bhh_p = bhh_p.at[:, g * Hp:g * Hp + H].set(
            params["b_hh"][:, g * H:(g + 1) * H])
    return emb_p, wih_p, whh_p, bih_p, bhh_p


@functools.partial(jax.jit, static_argnames=("hidden_size",))
def _encoder_rnn_call(tokens, h0_p, emb_p, wih_p, whh_p, bih_p, bhh_p,
                      hidden_size):
    V, Hp = emb_p.shape
    S = tokens.shape[0]

    # Chunk the sequence: single chunk up to 64 steps, otherwise 64-step chunks.
    chunk = min(64, _round_up(S, 8))
    s_pad = _round_up(S, chunk)
    num_chunks = s_pad // chunk

    # Pre-gather embeddings (one contiguous staging copy instead of S tiny
    # data-dependent DMAs on the recurrence's critical path).
    # Out-of-range token ids are clamped (PyTorch nn.Embedding would error).
    tokens = jnp.clip(tokens.astype(jnp.int32), 0, V - 1)
    x = jnp.take(emb_p, tokens, axis=0)                       # (S, Hp)
    x_all = jnp.zeros((s_pad, Hp), jnp.float32).at[:S, :].set(x)

    outs = pl.pallas_call(
        encoder_gru_kernel,
        out_shape=jax.ShapeDtypeStruct((s_pad, Hp), jnp.float32),
        grid_spec=pltpu.PrefetchScalarGridSpec(
            num_scalar_prefetch=0,
            grid=(num_chunks,),
            in_specs=[
                pl.BlockSpec((chunk, Hp), lambda c: (c, 0)),
                # Weights/biases: constant index_map -> DMA'd once, resident.
                pl.BlockSpec((Hp, 3 * Hp), lambda c: (0, 0)),
                pl.BlockSpec((Hp, 3 * Hp), lambda c: (0, 0)),
                pl.BlockSpec((1, 3 * Hp), lambda c: (0, 0)),
                pl.BlockSpec((1, 3 * Hp), lambda c: (0, 0)),
                pl.BlockSpec((1, Hp), lambda c: (0, 0)),
            ],
            out_specs=pl.BlockSpec((chunk, Hp), lambda c: (c, 0)),
            scratch_shapes=[
                pltpu.VMEM((1, Hp), jnp.float32),            # recurrent hidden
                pltpu.VMEM((chunk, 3 * Hp), jnp.float32),    # hoisted GI
            ],
        ),
        compiler_params=pltpu.CompilerParams(
            dimension_semantics=("arbitrary",),  # recurrence: sequential chunks
        ),
    )(x_all, wih_p, whh_p, bih_p, bhh_p, h0_p)

    H = hidden_size
    outputs = outs[:S, :H].reshape(S, 1, H)
    hidden_new = outs[S - 1, :H].reshape(1, 1, H)
    return outputs, hidden_new


def encoder_rnn_forward(tokens, hidden, params):
    """Run the GRU encoder over `tokens`.

    tokens: int32 scalar or (S,) token ids; hidden: (1, 1, H) float32.
    Returns (outputs, hidden_new): outputs (S, 1, H), hidden_new (1, 1, H).
    For S == 1 this is exactly PyTorch EncoderRNN.forward(input, hidden).
    """
    H = params["embedding"].shape[1]
    Hp = max(128, _round_up(H, 128))   # lane-dense state

    tokens = jnp.asarray(tokens, dtype=jnp.int32).reshape((-1,))
    h0_p = jnp.zeros((1, Hp), jnp.float32).at[:, :H].set(
        hidden.reshape(1, H).astype(jnp.float32))

    emb_p, wih_p, whh_p, bih_p, bhh_p = _pad_params(params, Hp)
    return _encoder_rnn_call(tokens, h0_p, emb_p, wih_p, whh_p, bih_p, bhh_p, H)


def init_params(key, input_size, hidden_size):
    """nn.Embedding default init (normal) + PyTorch GRU uniform(-1/sqrt(H), 1/sqrt(H))."""
    k_emb, k_wih, k_whh, k_bih, k_bhh = jax.random.split(key, 5)
    bound = 1.0 / jnp.sqrt(jnp.float32(hidden_size))
    u = lambda k, shape: jax.random.uniform(
        k, shape, dtype=jnp.float32, minval=-bound, maxval=bound)
    return {
        "embedding": jax.random.normal(k_emb, (input_size, hidden_size), jnp.float32),
        "w_ih": u(k_wih, (3 * hidden_size, hidden_size)),
        "w_hh": u(k_whh, (3 * hidden_size, hidden_size)),
        "b_ih": u(k_bih, (1, 3 * hidden_size)),
        "b_hh": u(k_bhh, (1, 3 * hidden_size)),
    }


def gru_reference(tokens, hidden, params):
    """Pure-JAX reference of the PyTorch GRU recurrence."""
    H = params["embedding"].shape[1]
    h = hidden.reshape(1, H)
    outs = []
    for t in list(tokens):
        x = params["embedding"][t].reshape(1, H)
        gi = x @ params["w_ih"].T + params["b_ih"]
        gh = h @ params["w_hh"].T + params["b_hh"]
        r = jax.nn.sigmoid(gi[:, :H] + gh[:, :H])
        z = jax.nn.sigmoid(gi[:, H:2 * H] + gh[:, H:2 * H])
        n = jnp.tanh(gi[:, 2 * H:] + r * gh[:, 2 * H:])
        h = (1.0 - z) * n + z * h
        outs.append(h)
    return jnp.stack(outs, axis=0), h.reshape(1, 1, H)


if __name__ == "__main__":
    input_size = 16    # vocab size
    hidden_size = 32
    seq_len = 8

    key = jax.random.PRNGKey(0)
    params = init_params(key, input_size, hidden_size)

    tokens = jax.random.randint(jax.random.PRNGKey(1), (seq_len,), 0, input_size,
                                dtype=jnp.int32)
    hidden0 = jnp.zeros((1, 1, hidden_size), dtype=jnp.float32)   # initHidden()

    # --- sequence encode: one pallas_call (single chunk) for all 8 steps ---
    outputs, hidden_new = encoder_rnn_forward(tokens, hidden0, params)
    jax.block_until_ready((outputs, hidden_new))

    ref_outs, ref_hidden = gru_reference(tokens, hidden0, params)
    assert outputs.shape == (seq_len, 1, hidden_size)
    assert hidden_new.shape == (1, 1, hidden_size)
    assert jnp.allclose(outputs, ref_outs, atol=1e-5), "sequence outputs mismatch"
    assert jnp.allclose(hidden_new, ref_hidden, atol=1e-5), "final hidden mismatch"

    # --- single-step call: exactly the PyTorch module's forward(input, hidden) ---
    out1, hid1 = encoder_rnn_forward(jnp.array([5], dtype=jnp.int32), hidden0, params)
    jax.block_until_ready((out1, hid1))
    ref_out1, ref_hid1 = gru_reference(jnp.array([5], dtype=jnp.int32), hidden0, params)
    assert out1.shape == (1, 1, hidden_size) and hid1.shape == (1, 1, hidden_size)
    assert jnp.allclose(out1, ref_out1, atol=1e-5)
    assert jnp.allclose(hid1, ref_hid1, atol=1e-5)

    print("KERNEL_OK")
</pallas_src>

<mosaic_0001>
module attributes {stable_mosaic.version = 11 : i64} {
  func.func @encoder_gru_kernel(%arg0: i32, %arg1: memref<8x128xf32, #tpu.memory_space<vmem>>, %arg2: memref<128x384xf32, #tpu.memory_space<vmem>>, %arg3: memref<128x384xf32, #tpu.memory_space<vmem>>, %arg4: memref<1x384xf32, #tpu.memory_space<vmem>>, %arg5: memref<1x384xf32, #tpu.memory_space<vmem>>, %arg6: memref<1x128xf32, #tpu.memory_space<vmem>>, %arg7: memref<8x128xf32, #tpu.memory_space<vmem>>, %arg8: memref<1x128xf32, #tpu.memory_space<vmem>>, %arg9: memref<8x384xf32, #tpu.memory_space<vmem>>) attributes {dimension_semantics = [#tpu.dimension_semantics<arbitrary>], iteration_bounds = array<i64: 1>, scalar_prefetch = 0 : i64, scratch_operands = 2 : i64, tpu.core_type = #tpu.core_type<tc>, window_params = [{transform_indices = @transform_0, window_bounds = array<i64: 8, 128>}, {pipeline_mode = #tpu.pipeline_mode<synchronous>, transform_indices = @transform_1, window_bounds = array<i64: 128, 384>}, {pipeline_mode = #tpu.pipeline_mode<synchronous>, transform_indices = @transform_2, window_bounds = array<i64: 128, 384>}, {pipeline_mode = #tpu.pipeline_mode<synchronous>, transform_indices = @transform_3, window_bounds = array<i64: 1, 384>}, {pipeline_mode = #tpu.pipeline_mode<synchronous>, transform_indices = @transform_4, window_bounds = array<i64: 1, 384>}, {pipeline_mode = #tpu.pipeline_mode<synchronous>, transform_indices = @transform_5, window_bounds = array<i64: 1, 128>}, {transform_indices = @transform_6, window_bounds = array<i64: 8, 128>}]} {
    %c0_i32 = arith.constant 0 : i32
    %0 = arith.cmpi eq, %arg0, %c0_i32 : i32
    %1 = arith.extui %0 : i1 to i32
    %c0_i32_0 = arith.constant 0 : i32
    %2 = arith.cmpi ne, %1, %c0_i32_0 : i32
    scf.if %2 {
      %c0_93 = arith.constant 0 : index
      %c0_94 = arith.constant 0 : index
      %284 = vector.load %arg6[%c0_93, %c0_94] : memref<1x128xf32, #tpu.memory_space<vmem>>, vector<1x128xf32>
      %c0_95 = arith.constant 0 : index
      %c0_96 = arith.constant 0 : index
      %285 = vector.load %arg8[%c0_95, %c0_96] : memref<1x128xf32, #tpu.memory_space<vmem>>, vector<1x128xf32>
      tpu.vector_store %arg8[%c0_95, %c0_96], %284 {strides = array<i32>} : memref<1x128xf32, #tpu.memory_space<vmem>>, vector<1x128xf32>,
    } else {
    }
    %c0 = arith.constant 0 : index
    %c0_1 = arith.constant 0 : index
    %3 = vector.load %arg1[%c0, %c0_1] : memref<8x128xf32, #tpu.memory_space<vmem>>, vector<8x128xf32>
    %c0_2 = arith.constant 0 : index
    %c0_3 = arith.constant 0 : index
    %4 = vector.load %arg2[%c0_2, %c0_3] : memref<128x384xf32, #tpu.memory_space<vmem>>, vector<128x384xf32>
    %cst = arith.constant dense<0.000000e+00> : vector<8x384xf32>
    %5 = tpu.matmul %3, %4, %cst {dimension_numbers = #tpu.dot_dimension_numbers<[1], [0], [0], [1], [0, 0, 1, 1], [], []>} : vector<8x128xf32>, vector<128x384xf32>, vector<8x384xf32> -> vector<8x384xf32>
    %c0_4 = arith.constant 0 : index
    %c0_5 = arith.constant 0 : index
    %6 = vector.load %arg4[%c0_4, %c0_5] : memref<1x384xf32, #tpu.memory_space<vmem>>, vector<1x384xf32>
    %7 = vector.broadcast %6 : vector<1x384xf32> to vector<8x384xf32>
    %8 = arith.addf %5, %7 : vector<8x384xf32>
    %c0_6 = arith.constant 0 : index
    %c0_7 = arith.constant 0 : index
    %9 = vector.load %arg9[%c0_6, %c0_7] : memref<8x384xf32, #tpu.memory_space<vmem>>, vector<8x384xf32>
    tpu.vector_store %arg9[%c0_6, %c0_7], %8 {strides = array<i32>} : memref<8x384xf32, #tpu.memory_space<vmem>>, vector<8x384xf32>,
    %c0_8 = arith.constant 0 : index
    %c0_9 = arith.constant 0 : index
    %10 = vector.load %arg8[%c0_8, %c0_9] : memref<1x128xf32, #tpu.memory_space<vmem>>, vector<1x128xf32>
    %c0_i32_10 = arith.constant 0 : i32
    %11 = arith.index_cast %c0_i32_10 : i32 to index
    %c0_11 = arith.constant 0 : index
    %12 = vector.load %arg9[%11, %c0_11] : memref<8x384xf32, #tpu.memory_space<vmem>>, vector<1x384xf32>
    %c0_12 = arith.constant 0 : index
    %c0_13 = arith.constant 0 : index
    %13 = vector.load %arg3[%c0_12, %c0_13] : memref<128x384xf32, #tpu.memory_space<vmem>>, vector<128x384xf32>
    %cst_14 = arith.constant dense<0.000000e+00> : vector<1x384xf32>
    %14 = tpu.matmul %10, %13, %cst_14 {dimension_numbers = #tpu.dot_dimension_numbers<[1], [0], [0], [1], [0, 0, 1, 1], [], []>} : vector<1x128xf32>, vector<128x384xf32>, vector<1x384xf32> -> vector<1x384xf32>
    %c0_15 = arith.constant 0 : index
    %c0_16 = arith.constant 0 : index
    %15 = vector.load %arg5[%c0_15, %c0_16] : memref<1x384xf32, #tpu.memory_space<vmem>>, vector<1x384xf32>
    %16 = arith.addf %14, %15 : vector<1x384xf32>
    %17 = vector.extract_strided_slice %12 {offsets = [0, 0], sizes = [1, 128], strides = [1, 1]} : vector<1x384xf32> to vector<1x128xf32>
    %18 = vector.extract_strided_slice %16 {offsets = [0, 0], sizes = [1, 128], strides = [1, 1]} : vector<1x384xf32> to vector<1x128xf32>
    %19 = arith.addf %17, %18 : vector<1x128xf32>
    %20 = arith.negf %19 : vector<1x128xf32>
    %21 = math.exp %20 : vector<1x128xf32>
    %cst_17 = arith.constant 1.000000e+00 : f32
    %22 = vector.broadcast %cst_17 : f32 to vector<1x128xf32>
    %23 = arith.addf %22, %21 : vector<1x128xf32>
    %24 = arith.divf %22, %23 : vector<1x128xf32>
    %25 = vector.extract_strided_slice %12 {offsets = [0, 128], sizes = [1, 128], strides = [1, 1]} : vector<1x384xf32> to vector<1x128xf32>
    %26 = vector.extract_strided_slice %16 {offsets = [0, 128], sizes = [1, 128], strides = [1, 1]} : vector<1x384xf32> to vector<1x128xf32>
    %27 = arith.addf %25, %26 : vector<1x128xf32>
    %28 = arith.negf %27 : vector<1x128xf32>
    %29 = math.exp %28 : vector<1x128xf32>
    %cst_18 = arith.constant 1.000000e+00 : f32
    %30 = vector.broadcast %cst_18 : f32 to vector<1x128xf32>
    %31 = arith.addf %30, %29 : vector<1x128xf32>
    %32 = arith.divf %30, %31 : vector<1x128xf32>
    %33 = vector.extract_strided_slice %12 {offsets = [0, 256], sizes = [1, 128], strides = [1, 1]} : vector<1x384xf32> to vector<1x128xf32>
    %34 = vector.extract_strided_slice %16 {offsets = [0, 256], sizes = [1, 128], strides = [1, 1]} : vector<1x384xf32> to vector<1x128xf32>
    %35 = arith.mulf %24, %34 : vector<1x128xf32>
    %36 = arith.addf %33, %35 : vector<1x128xf32>
    %37 = math.tanh %36 : vector<1x128xf32>
    %cst_19 = arith.constant 1.000000e+00 : f32
    %38 = vector.broadcast %cst_19 : f32 to vector<1x128xf32>
    %39 = arith.subf %38, %32 : vector<1x128xf32>
    %40 = arith.mulf %39, %37 : vector<1x128xf32>
    %41 = arith.mulf %32, %10 : vector<1x128xf32>
    %42 = arith.addf %40, %41 : vector<1x128xf32>
    %43 = arith.index_cast %c0_i32_10 : i32 to index
    %c0_20 = arith.constant 0 : index
    %44 = vector.load %arg7[%43, %c0_20] : memref<8x128xf32, #tpu.memory_space<vmem>>, vector<1x128xf32>
    tpu.vector_store %arg7[%43, %c0_20], %42 {strides = array<i32>} : memref<8x128xf32, #tpu.memory_space<vmem>>, vector<1x128xf32>,
    %c1_i32 = arith.constant 1 : i32
    %45 = arith.index_cast %c1_i32 : i32 to index
    %c0_21 = arith.constant 0 : index
    %46 = vector.load %arg9[%45, %c0_21] : memref<8x384xf32, #tpu.memory_space<vmem>>, vector<1x384xf32>
    %c0_22 = arith.constant 0 : index
    %c0_23 = arith.constant 0 : index
    %47 = vector.load %arg3[%c0_22, %c0_23] : memref<128x384xf32, #tpu.memory_space<vmem>>, vector<128x384xf32>
    %cst_24 = arith.constant dense<0.000000e+00> : vector<1x384xf32>
    %48 = tpu.matmul %42, %47, %cst_24 {dimension_numbers = #tpu.dot_dimension_numbers<[1], [0], [0], [1], [0, 0, 1, 1], [], []>} : vector<1x128xf32>, vector<128x384xf32>, vector<1x384xf32> -> vector<1x384xf32>
    %c0_25 = arith.constant 0 : index
    %c0_26 = arith.constant 0 : index
    %49 = vector.load %arg5[%c0_25, %c0_26] : memref<1x384xf32, #tpu.memory_space<vmem>>, vector<1x384xf32>
    %50 = arith.addf %48, %49 : vector<1x384xf32>
    %51 = vector.extract_strided_slice %46 {offsets = [0, 0], sizes = [1, 128], strides = [1, 1]} : vector<1x384xf32> to vector<1x128xf32>
    %52 = vector.extract_strided_slice %50 {offsets = [0, 0], sizes = [1, 128], strides = [1, 1]} : vector<1x384xf32> to vector<1x128xf32>
    %53 = arith.addf %51, %52 : vector<1x128xf32>
    %54 = arith.negf %53 : vector<1x128xf32>
    %55 = math.exp %54 : vector<1x128xf32>
    %cst_27 = arith.constant 1.000000e+00 : f32
    %56 = vector.broadcast %cst_27 : f32 to vector<1x128xf32>
    %57 = arith.addf %56, %55 : vector<1x128xf32>
    %58 = arith.divf %56, %57 : vector<1x128xf32>
    %59 = vector.extract_strided_slice %46 {offsets = [0, 128], sizes = [1, 128], strides = [1, 1]} : vector<1x384xf32> to vector<1x128xf32>
    %60 = vector.extract_strided_slice %50 {offsets = [0, 128], sizes = [1, 128], strides = [1, 1]} : vector<1x384xf32> to vector<1x128xf32>
    %61 = arith.addf %59, %60 : vector<1x128xf32>
    %62 = arith.negf %61 : vector<1x128xf32>
    %63 = math.exp %62 : vector<1x128xf32>
    %cst_28 = arith.constant 1.000000e+00 : f32
    %64 = vector.broadcast %cst_28 : f32 to vector<1x128xf32>
    %65 = arith.addf %64, %63 : vector<1x128xf32>
    %66 = arith.divf %64, %65 : vector<1x128xf32>
    %67 = vector.extract_strided_slice %46 {offsets = [0, 256], sizes = [1, 128], strides = [1, 1]} : vector<1x384xf32> to vector<1x128xf32>
    %68 = vector.extract_strided_slice %50 {offsets = [0, 256], sizes = [1, 128], strides = [1, 1]} : vector<1x384xf32> to vector<1x128xf32>
    %69 = arith.mulf %58, %68 : vector<1x128xf32>
    %70 = arith.addf %67, %69 : vector<1x128xf32>
    %71 = math.tanh %70 : vector<1x128xf32>
    %cst_29 = arith.constant 1.000000e+00 : f32
    %72 = vector.broadcast %cst_29 : f32 to vector<1x128xf32>
    %73 = arith.subf %72, %66 : vector<1x128xf32>
    %74 = arith.mulf %73, %71 : vector<1x128xf32>
    %75 = arith.mulf %66, %42 : vector<1x128xf32>
    %76 = arith.addf %74, %75 : vector<1x128xf32>
    %77 = arith.index_cast %c1_i32 : i32 to index
    %c0_30 = arith.constant 0 : index
    %78 = vector.load %arg7[%77, %c0_30] : memref<8x128xf32, #tpu.memory_space<vmem>>, vector<1x128xf32>
    tpu.vector_store %arg7[%77, %c0_30], %76 {strides = array<i32>} : memref<8x128xf32, #tpu.memory_space<vmem>>, vector<1x128xf32>,
    %c2_i32 = arith.constant 2 : i32
    %79 = arith.index_cast %c2_i32 : i32 to index
    %c0_31 = arith.constant 0 : index
    %80 = vector.load %arg9[%79, %c0_31] : memref<8x384xf32, #tpu.memory_space<vmem>>, vector<1x384xf32>
    %c0_32 = arith.constant 0 : index
    %c0_33 = arith.constant 0 : index
    %81 = vector.load %arg3[%c0_32, %c0_33] : memref<128x384xf32, #tpu.memory_space<vmem>>, vector<128x384xf32>
    %cst_34 = arith.constant dense<0.000000e+00> : vector<1x384xf32>
    %82 = tpu.matmul %76, %81, %cst_34 {dimension_numbers = #tpu.dot_dimension_numbers<[1], [0], [0], [1], [0, 0, 1, 1], [], []>} : vector<1x128xf32>, vector<128x384xf32>, vector<1x384xf32> -> vector<1x384xf32>
    %c0_35 = arith.constant 0 : index
    %c0_36 = arith.constant 0 : index
    %83 = vector.load %arg5[%c0_35, %c0_36] : memref<1x384xf32, #tpu.memory_space<vmem>>, vector<1x384xf32>
    %84 = arith.addf %82, %83 : vector<1x384xf32>
    %85 = vector.extract_strided_slice %80 {offsets = [0, 0], sizes = [1, 128], strides = [1, 1]} : vector<1x384xf32> to vector<1x128xf32>
    %86 = vector.extract_strided_slice %84 {offsets = [0, 0], sizes = [1, 128], strides = [1, 1]} : vector<1x384xf32> to vector<1x128xf32>
    %87 = arith.addf %85, %86 : vector<1x128xf32>
    %88 = arith.negf %87 : vector<1x128xf32>
    %89 = math.exp %88 : vector<1x128xf32>
    %cst_37 = arith.constant 1.000000e+00 : f32
    %90 = vector.broadcast %cst_37 : f32 to vector<1x128xf32>
    %91 = arith.addf %90, %89 : vector<1x128xf32>
    %92 = arith.divf %90, %91 : vector<1x128xf32>
    %93 = vector.extract_strided_slice %80 {offsets = [0, 128], sizes = [1, 128], strides = [1, 1]} : vector<1x384xf32> to vector<1x128xf32>
    %94 = vector.extract_strided_slice %84 {offsets = [0, 128], sizes = [1, 128], strides = [1, 1]} : vector<1x384xf32> to vector<1x128xf32>
    %95 = arith.addf %93, %94 : vector<1x128xf32>
    %96 = arith.negf %95 : vector<1x128xf32>
    %97 = math.exp %96 : vector<1x128xf32>
    %cst_38 = arith.constant 1.000000e+00 : f32
    %98 = vector.broadcast %cst_38 : f32 to vector<1x128xf32>
    %99 = arith.addf %98, %97 : vector<1x128xf32>
    %100 = arith.divf %98, %99 : vector<1x128xf32>
    %101 = vector.extract_strided_slice %80 {offsets = [0, 256], sizes = [1, 128], strides = [1, 1]} : vector<1x384xf32> to vector<1x128xf32>
    %102 = vector.extract_strided_slice %84 {offsets = [0, 256], sizes = [1, 128], strides = [1, 1]} : vector<1x384xf32> to vector<1x128xf32>
    %103 = arith.mulf %92, %102 : vector<1x128xf32>
    %104 = arith.addf %101, %103 : vector<1x128xf32>
    %105 = math.tanh %104 : vector<1x128xf32>
    %cst_39 = arith.constant 1.000000e+00 : f32
    %106 = vector.broadcast %cst_39 : f32 to vector<1x128xf32>
    %107 = arith.subf %106, %100 : vector<1x128xf32>
    %108 = arith.mulf %107, %105 : vector<1x128xf32>
    %109 = arith.mulf %100, %76 : vector<1x128xf32>
    %110 = arith.addf %108, %109 : vector<1x128xf32>
    %111 = arith.index_cast %c2_i32 : i32 to index
    %c0_40 = arith.constant 0 : index
    %112 = vector.load %arg7[%111, %c0_40] : memref<8x128xf32, #tpu.memory_space<vmem>>, vector<1x128xf32>
    tpu.vector_store %arg7[%111, %c0_40], %110 {strides = array<i32>} : memref<8x128xf32, #tpu.memory_space<vmem>>, vector<1x128xf32>,
    %c3_i32 = arith.constant 3 : i32
    %113 = arith.index_cast %c3_i32 : i32 to index
    %c0_41 = arith.constant 0 : index
    %114 = vector.load %arg9[%113, %c0_41] : memref<8x384xf32, #tpu.memory_space<vmem>>, vector<1x384xf32>
    %c0_42 = arith.constant 0 : index
    %c0_43 = arith.constant 0 : index
    %115 = vector.load %arg3[%c0_42, %c0_43] : memref<128x384xf32, #tpu.memory_space<vmem>>, vector<128x384xf32>
    %cst_44 = arith.constant dense<0.000000e+00> : vector<1x384xf32>
    %116 = tpu.matmul %110, %115, %cst_44 {dimension_numbers = #tpu.dot_dimension_numbers<[1], [0], [0], [1], [0, 0, 1, 1], [], []>} : vector<1x128xf32>, vector<128x384xf32>, vector<1x384xf32> -> vector<1x384xf32>
    %c0_45 = arith.constant 0 : index
    %c0_46 = arith.constant 0 : index
    %117 = vector.load %arg5[%c0_45, %c0_46] : memref<1x384xf32, #tpu.memory_space<vmem>>, vector<1x384xf32>
    %118 = arith.addf %116, %117 : vector<1x384xf32>
    %119 = vector.extract_strided_slice %114 {offsets = [0, 0], sizes = [1, 128], strides = [1, 1]} : vector<1x384xf32> to vector<1x128xf32>
    %120 = vector.extract_strided_slice %118 {offsets = [0, 0], sizes = [1, 128], strides = [1, 1]} : vector<1x384xf32> to vector<1x128xf32>
    %121 = arith.addf %119, %120 : vector<1x128xf32>
    %122 = arith.negf %121 : vector<1x128xf32>
    %123 = math.exp %122 : vector<1x128xf32>
    %cst_47 = arith.constant 1.000000e+00 : f32
    %124 = vector.broadcast %cst_47 : f32 to vector<1x128xf32>
    %125 = arith.addf %124, %123 : vector<1x128xf32>
    %126 = arith.divf %124, %125 : vector<1x128xf32>
    %127 = vector.extract_strided_slice %114 {offsets = [0, 128], sizes = [1, 128], strides = [1, 1]} : vector<1x384xf32> to vector<1x128xf32>
    %128 = vector.extract_strided_slice %118 {offsets = [0, 128], sizes = [1, 128], strides = [1, 1]} : vector<1x384xf32> to vector<1x128xf32>
    %129 = arith.addf %127, %128 : vector<1x128xf32>
    %130 = arith.negf %129 : vector<1x128xf32>
    %131 = math.exp %130 : vector<1x128xf32>
    %cst_48 = arith.constant 1.000000e+00 : f32
    %132 = vector.broadcast %cst_48 : f32 to vector<1x128xf32>
    %133 = arith.addf %132, %131 : vector<1x128xf32>
    %134 = arith.divf %132, %133 : vector<1x128xf32>
    %135 = vector.extract_strided_slice %114 {offsets = [0, 256], sizes = [1, 128], strides = [1, 1]} : vector<1x384xf32> to vector<1x128xf32>
    %136 = vector.extract_strided_slice %118 {offsets = [0, 256], sizes = [1, 128], strides = [1, 1]} : vector<1x384xf32> to vector<1x128xf32>
    %137 = arith.mulf %126, %136 : vector<1x128xf32>
    %138 = arith.addf %135, %137 : vector<1x128xf32>
    %139 = math.tanh %138 : vector<1x128xf32>
    %cst_49 = arith.constant 1.000000e+00 : f32
    %140 = vector.broadcast %cst_49 : f32 to vector<1x128xf32>
    %141 = arith.subf %140, %134 : vector<1x128xf32>
    %142 = arith.mulf %141, %139 : vector<1x128xf32>
    %143 = arith.mulf %134, %110 : vector<1x128xf32>
    %144 = arith.addf %142, %143 : vector<1x128xf32>
    %145 = arith.index_cast %c3_i32 : i32 to index
    %c0_50 = arith.constant 0 : index
    %146 = vector.load %arg7[%145, %c0_50] : memref<8x128xf32, #tpu.memory_space<vmem>>, vector<1x128xf32>
    tpu.vector_store %arg7[%145, %c0_50], %144 {strides = array<i32>} : memref<8x128xf32, #tpu.memory_space<vmem>>, vector<1x128xf32>,
    %c4_i32 = arith.constant 4 : i32
    %147 = arith.index_cast %c4_i32 : i32 to index
    %c0_51 = arith.constant 0 : index
    %148 = vector.load %arg9[%147, %c0_51] : memref<8x384xf32, #tpu.memory_space<vmem>>, vector<1x384xf32>
    %c0_52 = arith.constant 0 : index
    %c0_53 = arith.constant 0 : index
    %149 = vector.load %arg3[%c0_52, %c0_53] : memref<128x384xf32, #tpu.memory_space<vmem>>, vector<128x384xf32>
    %cst_54 = arith.constant dense<0.000000e+00> : vector<1x384xf32>
    %150 = tpu.matmul %144, %149, %cst_54 {dimension_numbers = #tpu.dot_dimension_numbers<[1], [0], [0], [1], [0, 0, 1, 1], [], []>} : vector<1x128xf32>, vector<128x384xf32>, vector<1x384xf32> -> vector<1x384xf32>
    %c0_55 = arith.constant 0 : index
    %c0_56 = arith.constant 0 : index
    %151 = vector.load %arg5[%c0_55, %c0_56] : memref<1x384xf32, #tpu.memory_space<vmem>>, vector<1x384xf32>
    %152 = arith.addf %150, %151 : vector<1x384xf32>
    %153 = vector.extract_strided_slice %148 {offsets = [0, 0], sizes = [1, 128], strides = [1, 1]} : vector<1x384xf32> to vector<1x128xf32>
    %154 = vector.extract_strided_slice %152 {offsets = [0, 0], sizes = [1, 128], strides = [1, 1]} : vector<1x384xf32> to vector<1x128xf32>
    %155 = arith.addf %153, %154 : vector<1x128xf32>
    %156 = arith.negf %155 : vector<1x128xf32>
    %157 = math.exp %156 : vector<1x128xf32>
    %cst_57 = arith.constant 1.000000e+00 : f32
    %158 = vector.broadcast %cst_57 : f32 to vector<1x128xf32>
    %159 = arith.addf %158, %157 : vector<1x128xf32>
    %160 = arith.divf %158, %159 : vector<1x128xf32>
    %161 = vector.extract_strided_slice %148 {offsets = [0, 128], sizes = [1, 128], strides = [1, 1]} : vector<1x384xf32> to vector<1x128xf32>
    %162 = vector.extract_strided_slice %152 {offsets = [0, 128], sizes = [1, 128], strides = [1, 1]} : vector<1x384xf32> to vector<1x128xf32>
    %163 = arith.addf %161, %162 : vector<1x128xf32>
    %164 = arith.negf %163 : vector<1x128xf32>
    %165 = math.exp %164 : vector<1x128xf32>
    %cst_58 = arith.constant 1.000000e+00 : f32
    %166 = vector.broadcast %cst_58 : f32 to vector<1x128xf32>
    %167 = arith.addf %166, %165 : vector<1x128xf32>
    %168 = arith.divf %166, %167 : vector<1x128xf32>
    %169 = vector.extract_strided_slice %148 {offsets = [0, 256], sizes = [1, 128], strides = [1, 1]} : vector<1x384xf32> to vector<1x128xf32>
    %170 = vector.extract_strided_slice %152 {offsets = [0, 256], sizes = [1, 128], strides = [1, 1]} : vector<1x384xf32> to vector<1x128xf32>
    %171 = arith.mulf %160, %170 : vector<1x128xf32>
    %172 = arith.addf %169, %171 : vector<1x128xf32>
    %173 = math.tanh %172 : vector<1x128xf32>
    %cst_59 = arith.constant 1.000000e+00 : f32
    %174 = vector.broadcast %cst_59 : f32 to vector<1x128xf32>
    %175 = arith.subf %174, %168 : vector<1x128xf32>
    %176 = arith.mulf %175, %173 : vector<1x128xf32>
    %177 = arith.mulf %168, %144 : vector<1x128xf32>
    %178 = arith.addf %176, %177 : vector<1x128xf32>
    %179 = arith.index_cast %c4_i32 : i32 to index
    %c0_60 = arith.constant 0 : index
    %180 = vector.load %arg7[%179, %c0_60] : memref<8x128xf32, #tpu.memory_space<vmem>>, vector<1x128xf32>
    tpu.vector_store %arg7[%179, %c0_60], %178 {strides = array<i32>} : memref<8x128xf32, #tpu.memory_space<vmem>>, vector<1x128xf32>,
    %c5_i32 = arith.constant 5 : i32
    %181 = arith.index_cast %c5_i32 : i32 to index
    %c0_61 = arith.constant 0 : index
    %182 = vector.load %arg9[%181, %c0_61] : memref<8x384xf32, #tpu.memory_space<vmem>>, vector<1x384xf32>
    %c0_62 = arith.constant 0 : index
    %c0_63 = arith.constant 0 : index
    %183 = vector.load %arg3[%c0_62, %c0_63] : memref<128x384xf32, #tpu.memory_space<vmem>>, vector<128x384xf32>
    %cst_64 = arith.constant dense<0.000000e+00> : vector<1x384xf32>
    %184 = tpu.matmul %178, %183, %cst_64 {dimension_numbers = #tpu.dot_dimension_numbers<[1], [0], [0], [1], [0, 0, 1, 1], [], []>} : vector<1x128xf32>, vector<128x384xf32>, vector<1x384xf32> -> vector<1x384xf32>
    %c0_65 = arith.constant 0 : index
    %c0_66 = arith.constant 0 : index
    %185 = vector.load %arg5[%c0_65, %c0_66] : memref<1x384xf32, #tpu.memory_space<vmem>>, vector<1x384xf32>
    %186 = arith.addf %184, %185 : vector<1x384xf32>
    %187 = vector.extract_strided_slice %182 {offsets = [0, 0], sizes = [1, 128], strides = [1, 1]} : vector<1x384xf32> to vector<1x128xf32>
    %188 = vector.extract_strided_slice %186 {offsets = [0, 0], sizes = [1, 128], strides = [1, 1]} : vector<1x384xf32> to vector<1x128xf32>
    %189 = arith.addf %187, %188 : vector<1x128xf32>
    %190 = arith.negf %189 : vector<1x128xf32>
    %191 = math.exp %190 : vector<1x128xf32>
    %cst_67 = arith.constant 1.000000e+00 : f32
    %192 = vector.broadcast %cst_67 : f32 to vector<1x128xf32>
    %193 = arith.addf %192, %191 : vector<1x128xf32>
    %194 = arith.divf %192, %193 : vector<1x128xf32>
    %195 = vector.extract_strided_slice %182 {offsets = [0, 128], sizes = [1, 128], strides = [1, 1]} : vector<1x384xf32> to vector<1x128xf32>
    %196 = vector.extract_strided_slice %186 {offsets = [0, 128], sizes = [1, 128], strides = [1, 1]} : vector<1x384xf32> to vector<1x128xf32>
    %197 = arith.addf %195, %196 : vector<1x128xf32>
    %198 = arith.negf %197 : vector<1x128xf32>
    %199 = math.exp %198 : vector<1x128xf32>
    %cst_68 = arith.constant 1.000000e+00 : f32
    %200 = vector.broadcast %cst_68 : f32 to vector<1x128xf32>
    %201 = arith.addf %200, %199 : vector<1x128xf32>
    %202 = arith.divf %200, %201 : vector<1x128xf32>
    %203 = vector.extract_strided_slice %182 {offsets = [0, 256], sizes = [1, 128], strides = [1, 1]} : vector<1x384xf32> to vector<1x128xf32>
    %204 = vector.extract_strided_slice %186 {offsets = [0, 256], sizes = [1, 128], strides = [1, 1]} : vector<1x384xf32> to vector<1x128xf32>
    %205 = arith.mulf %194, %204 : vector<1x128xf32>
    %206 = arith.addf %203, %205 : vector<1x128xf32>
    %207 = math.tanh %206 : vector<1x128xf32>
    %cst_69 = arith.constant 1.000000e+00 : f32
    %208 = vector.broadcast %cst_69 : f32 to vector<1x128xf32>
    %209 = arith.subf %208, %202 : vector<1x128xf32>
    %210 = arith.mulf %209, %207 : vector<1x128xf32>
    %211 = arith.mulf %202, %178 : vector<1x128xf32>
    %212 = arith.addf %210, %211 : vector<1x128xf32>
    %213 = arith.index_cast %c5_i32 : i32 to index
    %c0_70 = arith.constant 0 : index
    %214 = vector.load %arg7[%213, %c0_70] : memref<8x128xf32, #tpu.memory_space<vmem>>, vector<1x128xf32>
    tpu.vector_store %arg7[%213, %c0_70], %212 {strides = array<i32>} : memref<8x128xf32, #tpu.memory_space<vmem>>, vector<1x128xf32>,
    %c6_i32 = arith.constant 6 : i32
    %215 = arith.index_cast %c6_i32 : i32 to index
    %c0_71 = arith.constant 0 : index
    %216 = vector.load %arg9[%215, %c0_71] : memref<8x384xf32, #tpu.memory_space<vmem>>, vector<1x384xf32>
    %c0_72 = arith.constant 0 : index
    %c0_73 = arith.constant 0 : index
    %217 = vector.load %arg3[%c0_72, %c0_73] : memref<128x384xf32, #tpu.memory_space<vmem>>, vector<128x384xf32>
    %cst_74 = arith.constant dense<0.000000e+00> : vector<1x384xf32>
    %218 = tpu.matmul %212, %217, %cst_74 {dimension_numbers = #tpu.dot_dimension_numbers<[1], [0], [0], [1], [0, 0, 1, 1], [], []>} : vector<1x128xf32>, vector<128x384xf32>, vector<1x384xf32> -> vector<1x384xf32>
    %c0_75 = arith.constant 0 : index
    %c0_76 = arith.constant 0 : index
    %219 = vector.load %arg5[%c0_75, %c0_76] : memref<1x384xf32, #tpu.memory_space<vmem>>, vector<1x384xf32>
    %220 = arith.addf %218, %219 : vector<1x384xf32>
    %221 = vector.extract_strided_slice %216 {offsets = [0, 0], sizes = [1, 128], strides = [1, 1]} : vector<1x384xf32> to vector<1x128xf32>
    %222 = vector.extract_strided_slice %220 {offsets = [0, 0], sizes = [1, 128], strides = [1, 1]} : vector<1x384xf32> to vector<1x128xf32>
    %223 = arith.addf %221, %222 : vector<1x128xf32>
    %224 = arith.negf %223 : vector<1x128xf32>
    %225 = math.exp %224 : vector<1x128xf32>
    %cst_77 = arith.constant 1.000000e+00 : f32
    %226 = vector.broadcast %cst_77 : f32 to vector<1x128xf32>
    %227 = arith.addf %226, %225 : vector<1x128xf32>
    %228 = arith.divf %226, %227 : vector<1x128xf32>
    %229 = vector.extract_strided_slice %216 {offsets = [0, 128], sizes = [1, 128], strides = [1, 1]} : vector<1x384xf32> to vector<1x128xf32>
    %230 = vector.extract_strided_slice %220 {offsets = [0, 128], sizes = [1, 128], strides = [1, 1]} : vector<1x384xf32> to vector<1x128xf32>
    %231 = arith.addf %229, %230 : vector<1x128xf32>
    %232 = arith.negf %231 : vector<1x128xf32>
    %233 = math.exp %232 : vector<1x128xf32>
    %cst_78 = arith.constant 1.000000e+00 : f32
    %234 = vector.broadcast %cst_78 : f32 to vector<1x128xf32>
    %235 = arith.addf %234, %233 : vector<1x128xf32>
    %236 = arith.divf %234, %235 : vector<1x128xf32>
    %237 = vector.extract_strided_slice %216 {offsets = [0, 256], sizes = [1, 128], strides = [1, 1]} : vector<1x384xf32> to vector<1x128xf32>
    %238 = vector.extract_strided_slice %220 {offsets = [0, 256], sizes = [1, 128], strides = [1, 1]} : vector<1x384xf32> to vector<1x128xf32>
    %239 = arith.mulf %228, %238 : vector<1x128xf32>
    %240 = arith.addf %237, %239 : vector<1x128xf32>
    %241 = math.tanh %240 : vector<1x128xf32>
    %cst_79 = arith.constant 1.000000e+00 : f32
    %242 = vector.broadcast %cst_79 : f32 to vector<1x128xf32>
    %243 = arith.subf %242, %236 : vector<1x128xf32>
    %244 = arith.mulf %243, %241 : vector<1x128xf32>
    %245 = arith.mulf %236, %212 : vector<1x128xf32>
    %246 = arith.addf %244, %245 : vector<1x128xf32>
    %247 = arith.index_cast %c6_i32 : i32 to index
    %c0_80 = arith.constant 0 : index
    %248 = vector.load %arg7[%247, %c0_80] : memref<8x128xf32, #tpu.memory_space<vmem>>, vector<1x128xf32>
    tpu.vector_store %arg7[%247, %c0_80], %246 {strides = array<i32>} : memref<8x128xf32, #tpu.memory_space<vmem>>, vector<1x128xf32>,
    %c7_i32 = arith.constant 7 : i32
    %249 = arith.index_cast %c7_i32 : i32 to index
    %c0_81 = arith.constant 0 : index
    %250 = vector.load %arg9[%249, %c0_81] : memref<8x384xf32, #tpu.memory_space<vmem>>, vector<1x384xf32>
    %c0_82 = arith.constant 0 : index
    %c0_83 = arith.constant 0 : index
    %251 = vector.load %arg3[%c0_82, %c0_83] : memref<128x384xf32, #tpu.memory_space<vmem>>, vector<128x384xf32>
    %cst_84 = arith.constant dense<0.000000e+00> : vector<1x384xf32>
    %252 = tpu.matmul %246, %251, %cst_84 {dimension_numbers = #tpu.dot_dimension_numbers<[1], [0], [0], [1], [0, 0, 1, 1], [], []>} : vector<1x128xf32>, vector<128x384xf32>, vector<1x384xf32> -> vector<1x384xf32>
    %c0_85 = arith.constant 0 : index
    %c0_86 = arith.constant 0 : index
    %253 = vector.load %arg5[%c0_85, %c0_86] : memref<1x384xf32, #tpu.memory_space<vmem>>, vector<1x384xf32>
    %254 = arith.addf %252, %253 : vector<1x384xf32>
    %255 = vector.extract_strided_slice %250 {offsets = [0, 0], sizes = [1, 128], strides = [1, 1]} : vector<1x384xf32> to vector<1x128xf32>
    %256 = vector.extract_strided_slice %254 {offsets = [0, 0], sizes = [1, 128], strides = [1, 1]} : vector<1x384xf32> to vector<1x128xf32>
    %257 = arith.addf %255, %256 : vector<1x128xf32>
    %258 = arith.negf %257 : vector<1x128xf32>
    %259 = math.exp %258 : vector<1x128xf32>
    %cst_87 = arith.constant 1.000000e+00 : f32
    %260 = vector.broadcast %cst_87 : f32 to vector<1x128xf32>
    %261 = arith.addf %260, %259 : vector<1x128xf32>
    %262 = arith.divf %260, %261 : vector<1x128xf32>
    %263 = vector.extract_strided_slice %250 {offsets = [0, 128], sizes = [1, 128], strides = [1, 1]} : vector<1x384xf32> to vector<1x128xf32>
    %264 = vector.extract_strided_slice %254 {offsets = [0, 128], sizes = [1, 128], strides = [1, 1]} : vector<1x384xf32> to vector<1x128xf32>
    %265 = arith.addf %263, %264 : vector<1x128xf32>
    %266 = arith.negf %265 : vector<1x128xf32>
    %267 = math.exp %266 : vector<1x128xf32>
    %cst_88 = arith.constant 1.000000e+00 : f32
    %268 = vector.broadcast %cst_88 : f32 to vector<1x128xf32>
    %269 = arith.addf %268, %267 : vector<1x128xf32>
    %270 = arith.divf %268, %269 : vector<1x128xf32>
    %271 = vector.extract_strided_slice %250 {offsets = [0, 256], sizes = [1, 128], strides = [1, 1]} : vector<1x384xf32> to vector<1x128xf32>
    %272 = vector.extract_strided_slice %254 {offsets = [0, 256], sizes = [1, 128], strides = [1, 1]} : vector<1x384xf32> to vector<1x128xf32>
    %273 = arith.mulf %262, %272 : vector<1x128xf32>
    %274 = arith.addf %271, %273 : vector<1x128xf32>
    %275 = math.tanh %274 : vector<1x128xf32>
    %cst_89 = arith.constant 1.000000e+00 : f32
    %276 = vector.broadcast %cst_89 : f32 to vector<1x128xf32>
    %277 = arith.subf %276, %270 : vector<1x128xf32>
    %278 = arith.mulf %277, %275 : vector<1x128xf32>
    %279 = arith.mulf %270, %246 : vector<1x128xf32>
    %280 = arith.addf %278, %279 : vector<1x128xf32>
    %281 = arith.index_cast %c7_i32 : i32 to index
    %c0_90 = arith.constant 0 : index
    %282 = vector.load %arg7[%281, %c0_90] : memref<8x128xf32, #tpu.memory_space<vmem>>, vector<1x128xf32>
    tpu.vector_store %arg7[%281, %c0_90], %280 {strides = array<i32>} : memref<8x128xf32, #tpu.memory_space<vmem>>, vector<1x128xf32>,
    %c8_i32 = arith.constant 8 : i32
    %c0_91 = arith.constant 0 : index
    %c0_92 = arith.constant 0 : index
    %283 = vector.load %arg8[%c0_91, %c0_92] : memref<1x128xf32, #tpu.memory_space<vmem>>, vector<1x128xf32>
    tpu.vector_store %arg8[%c0_91, %c0_92], %280 {strides = array<i32>} : memref<1x128xf32, #tpu.memory_space<vmem>>, vector<1x128xf32>,
    return
  }
  func.func @transform_0(%arg0: i32) -> (i32, i32) {
    %c0_i32 = arith.constant 0 : i32
    %c0_i32_0 = arith.constant 0 : i32
    return %arg0, %c0_i32 : i32, i32
  }
  func.func @transform_1(%arg0: i32) -> (i32, i32) {
    %c0_i32 = arith.constant 0 : i32
    %c0_i32_0 = arith.constant 0 : i32
    %c0_i32_1 = arith.constant 0 : i32
    return %c0_i32, %c0_i32_0 : i32, i32
  }
  func.func @transform_2(%arg0: i32) -> (i32, i32) {
    %c0_i32 = arith.constant 0 : i32
    %c0_i32_0 = arith.constant 0 : i32
    %c0_i32_1 = arith.constant 0 : i32
    return %c0_i32, %c0_i32_0 : i32, i32
  }
  func.func @transform_3(%arg0: i32) -> (i32, i32) {
    %c0_i32 = arith.constant 0 : i32
    %c0_i32_0 = arith.constant 0 : i32
    %c0_i32_1 = arith.constant 0 : i32
    return %c0_i32, %c0_i32_0 : i32, i32
  }
  func.func @transform_4(%arg0: i32) -> (i32, i32) {
    %c0_i32 = arith.constant 0 : i32
    %c0_i32_0 = arith.constant 0 : i32
    %c0_i32_1 = arith.constant 0 : i32
    return %c0_i32, %c0_i32_0 : i32, i32
  }
  func.func @transform_5(%arg0: i32) -> (i32, i32) {
    %c0_i32 = arith.constant 0 : i32
    %c0_i32_0 = arith.constant 0 : i32
    %c0_i32_1 = arith.constant 0 : i32
    return %c0_i32, %c0_i32_0 : i32, i32
  }
  func.func @transform_6(%arg0: i32) -> (i32, i32) {
    %c0_i32 = arith.constant 0 : i32
    %c0_i32_0 = arith.constant 0 : i32
    return %arg0, %c0_i32 : i32, i32
  }
}

</mosaic_0001>

<bundles_post_ra>
// kernel: _encoder_rnn_call.1
= control target key start
LH: loop header
LB: loop body
LE: loop exit
PB: predicated region body
PF: predicated region fallthrough
CT: control target
= control target key end

     0   :  { %11 = vsyncpa [#allocation5], 0  ;;  %s3861_s0 = inlined_call_operand.vmem [shape: f32[8,128], index: 0, kind: input, shape index: {}]   ;;  %s3862_s1 = inlined_call_operand.hbm [shape: f32[128,384], index: 1, kind: input, shape index: {}]   ;;  %s3863_s2 = inlined_call_operand.hbm [shape: f32[128,384], index: 2, kind: input, shape index: {}]   ;;  %s3864_s3 = inlined_call_operand.vmem [shape: f32[1,384], index: 3, kind: input, shape index: {}]   ;;  %s3865_s4 = inlined_call_operand.vmem [shape: f32[1,384], index: 4, kind: input, shape index: {}]   ;;  %s3866_s5 = inlined_call_operand.vmem [shape: f32[1,128], index: 5, kind: input, shape index: {}]   ;;  %s3867_s6 = inlined_call_operand.vmem [shape: f32[8,128], index: 6, kind: output, shape index: {}]  }
   0x1   :  { %12 = vsyncpa [#allocation7], 0  ;;  %s3277_s21 = smov [#allocation4]   ;;  %s3229_s25 = scalar_lea.hbm %s3862_s1, 6144 }
   0x2   :  { %s20_s22 = sshll.u32 %s3277_s21, 4  ;;  %p3230_p0 = scmp.ne.s32.totalorder %s3862_s1, %s3229_s25  ;;  %s21_s22 = int_to_ptr.vmem [resolvable:$true] %s20_s22 }
   0x3   :  { %p3233_p1 = scmp.lt.u32.totalorder %s3229_s25, %s3862_s1 }
   0x5   :  { %p3235_p2 = pnand %p3233_p1, %p3230_p0 }
   0x7   :  { %3238 = shalt.err (!%p3235_p2)
}
   0x8   :  { %s3239_s30 = scalar_lea.vmem %s21_s22, 6144  ;;  %p3244_p4 = scmp.lt.s32.totalorder %s21_s22, %s21_s22 }
   0x9   :  { %p3240_p3 = scmp.ne.s32.totalorder %s21_s22, %s3239_s30  ;;  %p3245_p5 = scmp.lt.s32.totalorder %s3239_s30, %s3239_s30 }
   0xb   :  { %p3246_p6 = por %p3245_p5, %p3244_p4 }
   0xd   :  { %p3247_p7 = pnand %p3246_p6, %p3240_p3 }
   0xf   :  { %3250 = shalt.err (!%p3247_p7)
}
  0x10   :  { %s3278_s7 = smov 384   ;;  %s3279_s8 = smov 24  }
  0x11   :  { %26 = dma.hbm_to_vmem [thread:$0]  %s3862_s1, 6144, %s21_s22, [#allocation5], %s3278_s7, %s3278_s7, %s3279_s8  }
  0x12   :  { %s3280_s11 = smov [#allocation6]   ;;  %s3251_s15 = scalar_lea.hbm %s3863_s2, 6144 }
  0x13   :  { %s32_s12 = sshll.u32 %s3280_s11, 4  ;;  %p3252_p8 = scmp.ne.s32.totalorder %s3863_s2, %s3251_s15  ;;  %s33_s12 = int_to_ptr.vmem [resolvable:$true] %s32_s12 }
  0x14   :  { %p3255_p9 = scmp.lt.u32.totalorder %s3251_s15, %s3863_s2 }
  0x16   :  { %p3257_p10 = pnand %p3255_p9, %p3252_p8 }
  0x18   :  { %3260 = shalt.err (!%p3257_p10)
}
  0x19   :  { %s3261_s20 = scalar_lea.vmem %s33_s12, 6144  ;;  %p3266_p12 = scmp.lt.s32.totalorder %s33_s12, %s33_s12 }
  0x1a   :  { %p3262_p11 = scmp.ne.s32.totalorder %s33_s12, %s3261_s20  ;;  %p3267_p13 = scmp.lt.s32.totalorder %s3261_s20, %s3261_s20 }
  0x1c   :  { %p3268_p0 = por %p3267_p13, %p3266_p12 }
  0x1e   :  { %p3269_p1 = pnand %p3268_p0, %p3262_p11 }
  0x20   :  { %3272 = shalt.err (!%p3269_p1)
}
  0x21   :  { %38 = dma.hbm_to_vmem [thread:$0]  %s3863_s2, 6144, %s33_s12, [#allocation7], %s3278_s7, %s3278_s7, %s3279_s8  }
  0x22   :  { %3273 = dma.done.wait [#allocation5], 6144  }
  0x23   :  { %3274 = vsyncadd [#allocation5], 4294961152 }
  0x24   :  { %3275 = dma.done.wait [#allocation7], 6144  }
  0x25   :  { %3276 = vsyncadd [#allocation7], 4294961152  ;;  %v3281_v0 = vmov 0.0|0.0   ;;  %v3282_v1 = vmov 0.0   ;;  %vm3283_vm0 = vmmov 0   ;;  %v59_v2 = vld [vmem:[#allocation4 + $0x8] sm:$0xff] }
  0x26   :  { %2670 = vmatprep.subr.bf16.mxu1 %v3281_v0  ;;  %187 = vmatprep.mubr.f32.mxu0 %v3282_v1  ;;  %v62_v3 = vld [vmem:[#allocation4 + $0x20] sm:$0xff]  ;;  %v61_v6 = vld [vmem:[#allocation4 + $0x18] sm:$0xff]  ;;  %v60_v7 = vld [vmem:[#allocation4 + $0x10] sm:$0xff] }
  0x27   :  { %2355 = vmatprep.mubr.msk.f32.mxu1 %vm3283_vm0, %v3282_v1  ;;  %v58_v4 = vld [vmem:[#allocation4] sm:$0xff]  ;;  %v2638_v5 = vpack.c.bf16 %v62_v3, %v59_v2  ;;  %v63_v8 = vld [vmem:[#allocation4 + $0x28] sm:$0xff]  ;;  %v65_v11 = vld [vmem:[#allocation4 + $0x38] sm:$0xff] }
  0x28   :  { %v2640_v9 = vpack.c.bf16 %v61_v6, %v58_v4  ;;  %v2671_v10 = vpack.c.bf16 %v63_v8, %v60_v7  ;;  %v68_v12 = vld [vmem:[#allocation4 + $0x50] sm:$0xff]  ;;  %v67_v15 = vld [vmem:[#allocation4 + $0x48] sm:$0xff]  ;;  %v66_v16 = vld [vmem:[#allocation4 + $0x40] sm:$0xff] }
  0x29   :  { %v64_v13 = vld [vmem:[#allocation4 + $0x30] sm:$0xff]  ;;  %2639 = vmatprep.subr.bf16.mxu0 %v2638_v5  ;;  %v2642_v14 = vpack.c.bf16 %v68_v12, %v65_v11  ;;  %v69_v17 = vld [vmem:[#allocation4 + $0x58] sm:$0xff]  ;;  %v71_v20 = vld [vmem:[#allocation4 + $0x68] sm:$0xff] }
  0x2a   :  { %2641 = vmatpush1.bf16.msra.mxu0 %v2640_v9  ;;  %2672 = vmatpush3.bf16.msra.mxu1 %v2671_v10  ;;  %v2644_v18 = vpack.c.bf16 %v67_v15, %v64_v13  ;;  %v2674_v19 = vpack.c.bf16 %v69_v17, %v66_v16  ;;  %v74_v21 = vld [vmem:[#allocation4 + $0x80] sm:$0xff]  ;;  %v73_v24 = vld [vmem:[#allocation4 + $0x78] sm:$0xff]  ;;  %v72_v25 = vld [vmem:[#allocation4 + $0x70] sm:$0xff] }
  0x2b   :  { %v70_v22 = vld [vmem:[#allocation4 + $0x60] sm:$0xff]  ;;  %2643 = vmatprep.subr.bf16.mxu0 %v2642_v14  ;;  %2673 = vmatprep.subr.bf16.mxu1 %v3281_v0  ;;  %v2646_v23 = vpack.c.bf16 %v74_v21, %v71_v20  ;;  %v75_v26 = vld [vmem:[#allocation4 + $0x88] sm:$0xff]  ;;  %v77_v27 = vld [vmem:[#allocation4 + $0x98] sm:$0xff] }
  0x2c   :  { %v80_v28 = vld [vmem:[#allocation4 + $0xb0] sm:$0xff]  ;;  %v2648_v29 = vpack.c.bf16 %v73_v24, %v70_v22  ;;  %v2677_v30 = vpack.c.bf16 %v75_v26, %v72_v25  ;;  %v79_v33 = vld [vmem:[#allocation4 + $0xa8] sm:$0xff]  ;;  %v78_v34 = vld [vmem:[#allocation4 + $0xa0] sm:$0xff] }
  0x2d   :  { %v76_v31 = vld [vmem:[#allocation4 + $0x90] sm:$0xff]  ;;  %v2650_v32 = vpack.c.bf16 %v80_v28, %v77_v27  ;;  %v81_v35 = vld [vmem:[#allocation4 + $0xb8] sm:$0xff]  ;;  %v83_v36 = vld [vmem:[#allocation4 + $0xc8] sm:$0xff] }
  0x2e   :  { %2645 = vmatpush1.bf16.msra.mxu0 %v2644_v18  ;;  %2675 = vmatpush3.bf16.msra.mxu1 %v2674_v19  ;;  %v86_v37 = vld [vmem:[#allocation4 + $0xe0] sm:$0xff]  ;;  %v2652_v38 = vpack.c.bf16 %v79_v33, %v76_v31  ;;  %v2680_v39 = vpack.c.bf16 %v81_v35, %v78_v34  ;;  %v85_v42 = vld [vmem:[#allocation4 + $0xd8] sm:$0xff]  ;;  %v84_v43 = vld [vmem:[#allocation4 + $0xd0] sm:$0xff] }
  0x2f   :  { %2647 = vmatprep.subr.bf16.mxu0 %v2646_v23  ;;  %2676 = vmatprep.subr.bf16.mxu1 %v3281_v0  ;;  %v82_v40 = vld [vmem:[#allocation4 + $0xc0] sm:$0xff]  ;;  %v2654_v41 = vpack.c.bf16 %v86_v37, %v83_v36  ;;  %v87_v44 = vld [vmem:[#allocation4 + $0xe8] sm:$0xff]  ;;  %v89_v45 = vld [vmem:[#allocation4 + $0xf8] sm:$0xff] }
  0x30   :  { %v92_v46 = vld [vmem:[#allocation4 + $0x110] sm:$0xff]  ;;  %v2656_v47 = vpack.c.bf16 %v85_v42, %v82_v40  ;;  %v2683_v48 = vpack.c.bf16 %v87_v44, %v84_v43  ;;  %v91_v51 = vld [vmem:[#allocation4 + $0x108] sm:$0xff]  ;;  %v90_v52 = vld [vmem:[#allocation4 + $0x100] sm:$0xff] }
  0x31   :  { %v88_v49 = vld [vmem:[#allocation4 + $0xf0] sm:$0xff]  ;;  %v2658_v50 = vpack.c.bf16 %v92_v46, %v89_v45  ;;  %v93_v53 = vld [vmem:[#allocation4 + $0x118] sm:$0xff]  ;;  %v95_v54 = vld [vmem:[#allocation4 + $0x128] sm:$0xff] }
  0x32   :  { %2649 = vmatpush1.bf16.msra.mxu0 %v2648_v29  ;;  %2678 = vmatpush3.bf16.msra.mxu1 %v2677_v30  ;;  %v98_v55 = vld [vmem:[#allocation4 + $0x140] sm:$0xff]  ;;  %v2660_v56 = vpack.c.bf16 %v91_v51, %v88_v49  ;;  %v2686_v57 = vpack.c.bf16 %v93_v53, %v90_v52  ;;  %v97_v60 = vld [vmem:[#allocation4 + $0x138] sm:$0xff]  ;;  %v96_v61 = vld [vmem:[#allocation4 + $0x130] sm:$0xff] }
  0x33   :  { %2651 = vmatprep.subr.bf16.mxu0 %v2650_v32  ;;  %2679 = vmatprep.subr.bf16.mxu1 %v3281_v0  ;;  %v94_v58 = vld [vmem:[#allocation4 + $0x120] sm:$0xff]  ;;  %v2662_v59 = vpack.c.bf16 %v98_v55, %v95_v54  ;;  %v99_v62 = vld [vmem:[#allocation4 + $0x148] sm:$0xff]  ;;  %v101_v63 = vld [vmem:[#allocation4 + $0x158] sm:$0xff] }
  0x34   :  { %v104_v2 = vld [vmem:[#allocation4 + $0x170] sm:$0xff]  ;;  %v2664_v3 = vpack.c.bf16 %v97_v60, %v94_v58  ;;  %v2689_v4 = vpack.c.bf16 %v99_v62, %v96_v61  ;;  %v103_v7 = vld [vmem:[#allocation4 + $0x168] sm:$0xff]  ;;  %v102_v8 = vld [vmem:[#allocation4 + $0x160] sm:$0xff] }
  0x35   :  { %v100_v5 = vld [vmem:[#allocation4 + $0x150] sm:$0xff]  ;;  %v2666_v6 = vpack.c.bf16 %v104_v2, %v101_v63  ;;  %v105_v9 = vld [vmem:[#allocation4 + $0x178] sm:$0xff]  ;;  %v270_v10 = vld [vmem:[#allocation6 + $0x8] sm:$0xff] }
  0x36   :  { %2653 = vmatpush1.bf16.msra.mxu0 %v2652_v38  ;;  %2681 = vmatpush3.bf16.msra.mxu1 %v2680_v39  ;;  %v273_v11 = vld [vmem:[#allocation6 + $0x20] sm:$0xff]  ;;  %v55_v12 = vld [vmem:[%s3866_s5] sm:$0x1]  ;;  %v2668_v13 = vpack.c.bf16 %v103_v7, %v100_v5  ;;  %v2692_v14 = vpack.c.bf16 %v105_v9, %v102_v8  ;;  %v272_v17 = vld [vmem:[#allocation6 + $0x18] sm:$0xff] }
  0x37   :  { %2655 = vmatprep.subr.bf16.mxu0 %v2654_v41  ;;  %2682 = vmatprep.subr.bf16.mxu1 %v3281_v0  ;;  %v269_v15 = vld [vmem:[#allocation6] sm:$0xff]  ;;  %56 = vst [vmem:[#allocation2] sm:$0x1] %v55_v12  ;;  %v3357_v16 = vpack.c.bf16 %v273_v11, %v270_v10  ;;  %v271_v18 = vld [vmem:[#allocation6 + $0x10] sm:$0xff]  ;;  %v274_v19 = vld [vmem:[#allocation6 + $0x28] sm:$0xff] }
  0x38   :  { %v276_v20 = vld [vmem:[#allocation6 + $0x38] sm:$0xff]  ;;  %v279_v21 = vld [vmem:[#allocation6 + $0x50] sm:$0xff]  ;;  %v3362_v23 = vpack.c.bf16 %v272_v17, %v269_v15  ;;  %v3364_v25 = vpack.c.bf16 %v274_v19, %v271_v18  ;;  %v278_v27 = vld [vmem:[#allocation6 + $0x48] sm:$0xff] }
  0x39   :  { %v57_v22 = vld [vmem:[%s3861_s0] sm:$0xff]  ;;  %v3367_v26 = vpack.c.bf16 %v279_v21, %v276_v20  ;;  %v277_v28 = vld [vmem:[#allocation6 + $0x40] sm:$0xff]  ;;  %v282_v30 = vld [vmem:[#allocation6 + $0x68] sm:$0xff] }
  0x3a   :  { %2657 = vmatpush1.bf16.msra.mxu0 %v2656_v47  ;;  %2684 = vmatpush3.bf16.msra.mxu1 %v2683_v48  ;;  %v275_v24 = vld [vmem:[#allocation6 + $0x30] sm:$0xff]  ;;  %v280_v29 = vld [vmem:[#allocation6 + $0x58] sm:$0xff]  ;;  %v285_v31 = vld [vmem:[#allocation6 + $0x80] sm:$0xff] }
  0x3b   :  { %2659 = vmatprep.subr.bf16.mxu0 %v2658_v50  ;;  %2685 = vmatprep.subr.bf16.mxu1 %v3281_v0  ;;  %v3371_v32 = vpack.c.bf16 %v278_v27, %v275_v24  ;;  %v281_v33 = vld [vmem:[#allocation6 + $0x60] sm:$0xff]  ;;  %v3374_v34 = vpack.c.bf16 %v280_v29, %v277_v28  ;;  %v3377_v35 = vpack.c.bf16 %v285_v31, %v282_v30  ;;  %v284_v36 = vld [vmem:[#allocation6 + $0x78] sm:$0xff]  ;;  %v283_v37 = vld [vmem:[#allocation6 + $0x70] sm:$0xff]  ;;  %v108_v29 = vlaneseq }
  0x3c   :  { %v286_v38 = vld [vmem:[#allocation6 + $0x88] sm:$0xff]  ;;  %v288_v39 = vld [vmem:[#allocation6 + $0x98] sm:$0xff]  ;;  %v291_v40 = vld [vmem:[#allocation6 + $0xb0] sm:$0xff]  ;;  %v3384_v41 = vpack.c.bf16 %v284_v36, %v281_v33 }
  0x3d   :  { %v287_v42 = vld [vmem:[#allocation6 + $0x90] sm:$0xff]  ;;  %v3387_v43 = vpack.c.bf16 %v286_v38, %v283_v37  ;;  %v3390_v44 = vpack.c.bf16 %v291_v40, %v288_v39  ;;  %v290_v45 = vld [vmem:[#allocation6 + $0xa8] sm:$0xff]  ;;  %v289_v46 = vld [vmem:[#allocation6 + $0xa0] sm:$0xff]  ;;  %v109_v30 = vshrl.u32 %v108_v29, 7 }
  0x3e   :  { %2661 = vmatpush1.bf16.msra.mxu0 %v2660_v56  ;;  %2687 = vmatpush3.bf16.msra.mxu1 %v2686_v57  ;;  %v292_v47 = vld [vmem:[#allocation6 + $0xb8] sm:$0xff]  ;;  %v294_v48 = vld [vmem:[#allocation6 + $0xc8] sm:$0xff]  ;;  %v297_v49 = vld [vmem:[#allocation6 + $0xe0] sm:$0xff]  ;;  %v3394_v50 = vpack.c.bf16 %v290_v45, %v287_v42 }
  0x3f   :  { %2663 = vmatprep.subr.bf16.mxu0 %v2662_v59  ;;  %2688 = vmatprep.subr.bf16.mxu1 %v3281_v0  ;;  %v293_v51 = vld [vmem:[#allocation6 + $0xc0] sm:$0xff]  ;;  %v3397_v52 = vpack.c.bf16 %v292_v47, %v289_v46  ;;  %v3400_v53 = vpack.c.bf16 %v297_v49, %v294_v48  ;;  %v296_v54 = vld [vmem:[#allocation6 + $0xd8] sm:$0xff]  ;;  %v295_v55 = vld [vmem:[#allocation6 + $0xd0] sm:$0xff]  ;;  %v3484_v31 = vsub.s32 0, %v109_v30  ;;  %v3486_v33 = vsub.s32 2, %v109_v30 }
  0x40   :  { %v298_v56 = vld [vmem:[#allocation6 + $0xe8] sm:$0xff]  ;;  %v300_v57 = vld [vmem:[#allocation6 + $0xf8] sm:$0xff]  ;;  %v303_v58 = vld [vmem:[#allocation6 + $0x110] sm:$0xff]  ;;  %v3404_v59 = vpack.c.bf16 %v296_v54, %v293_v51  ;;  %v3491_v37 = vsub.s32 1, %v109_v30 }
  0x41   :  { %v299_v60 = vld [vmem:[#allocation6 + $0xf0] sm:$0xff]  ;;  %v3407_v61 = vpack.c.bf16 %v298_v56, %v295_v55  ;;  %v3410_v62 = vpack.c.bf16 %v303_v58, %v300_v57  ;;  %v302_v63 = vld [vmem:[#allocation6 + $0x108] sm:$0xff]  ;;  %v301_v2 = vld [vmem:[#allocation6 + $0x100] sm:$0xff] }
  0x42   :  { %2665 = vmatpush1.bf16.msra.mxu0 %v2664_v3  ;;  %2690 = vmatpush3.bf16.msra.mxu1 %v2689_v4  ;;  %v304_v3 = vld [vmem:[#allocation6 + $0x118] sm:$0xff]  ;;  %v306_v4 = vld [vmem:[#allocation6 + $0x128] sm:$0xff]  ;;  %v309_v5 = vld [vmem:[#allocation6 + $0x140] sm:$0xff] }
  0x43   :  { %2667 = vmatprep.subr.bf16.mxu0 %v2666_v6  ;;  %2691 = vmatprep.subr.bf16.mxu1 %v3281_v0  ;;  %v3414_v6 = vpack.c.bf16 %v302_v63, %v299_v60  ;;  %v305_v7 = vld [vmem:[#allocation6 + $0x120] sm:$0xff]  ;;  %v3417_v8 = vpack.c.bf16 %v304_v3, %v301_v2  ;;  %v3420_v9 = vpack.c.bf16 %v309_v5, %v306_v4  ;;  %v308_v10 = vld [vmem:[#allocation6 + $0x138] sm:$0xff]  ;;  %v307_v11 = vld [vmem:[#allocation6 + $0x130] sm:$0xff] }
  0x44   :  { %v310_v12 = vld [vmem:[#allocation6 + $0x148] sm:$0xff]  ;;  %v3424_v15 = vpack.c.bf16 %v308_v10, %v305_v7  ;;  %v311_v17 = vld [vmem:[#allocation6 + $0x150] sm:$0xff]  ;;  %v313_v21 = vld [vmem:[#allocation6 + $0x160] sm:$0xff] }
  0x45   :  { %v3427_v18 = vpack.c.bf16 %v310_v12, %v307_v11  ;;  %v314_v20 = vld [vmem:[#allocation6 + $0x168] sm:$0xff]  ;;  %v3442_v28 = vld [vmem:[#allocation2] sm:$0x1]  ;;  %v106_v36 = vld [vmem:[%s3864_s3] sm:$0x7] }
  0x46   :  { %2669 = vmatpush1.bf16.msra.mxu0 %v2668_v13  ;;  %2693 = vmatpush3.bf16.msra.mxu1 %v2692_v14  ;;  %v312_v13 = vld [vmem:[#allocation6 + $0x158] sm:$0xff]  ;;  %v315_v14 = vld [vmem:[#allocation6 + $0x170] sm:$0xff]  ;;  %v3434_v24 = vpack.c.bf16 %v314_v20, %v311_v17  ;;  %v111_v38 = vrot.slane %v106_v36, %v3484_v31  ;;  %v119_v39 = vrot.slane %v106_v36, %v3486_v33 }
  0x47   :  { %2695 = vmatprep.subr.bf16.mxu0 %v3357_v16  ;;  %2726 = vmatprep.subr.bf16.mxu1 %v3281_v0  ;;  %v3430_v19 = vpack.c.bf16 %v315_v14, %v312_v13  ;;  %v115_v40 = vrot.slane %v106_v36, %v3491_v37  ;;  %v317_v54 = vld [vmem:[%s3865_s4] sm:$0x7] }
  0x48   :  { %v322_v55 = vrot.slane %v317_v54, %v3484_v31  ;;  %v326_v56 = vrot.slane %v317_v54, %v3491_v37  ;;  %v330_v17 = vrot.slane %v317_v54, %v3486_v33 }
  0x49   :  { %188 = vmatmul.mubr.f32.vlgmr.msra.gmra.mrb[0].mxu0 %v57_v22  ;;  %2356 = vmatmul.mubr.f32.vlgmr.msra.gmra.mrb[0].mxu1 %v57_v22  ;;  %v316_v22 = vld [vmem:[#allocation6 + $0x178] sm:$0xff] }
  0x4a   :  { %2697 = vmatpush1.bf16.msra.mxu0 %v3362_v23  ;;  %2728 = vmatpush3.bf16.msra.mxu1 %v3364_v25  ;;  %v3437_v27 = vpack.c.bf16 %v316_v22, %v313_v21 }
  0x4b   :  { %2699 = vmatprep.subr.bf16.mxu0 %v3367_v26  ;;  %398 = vmatprep.mubr.f32.mxu0 %v3282_v1 }
  0x4c   :  { %2729 = vmatprep.subr.bf16.mxu1 %v3281_v0  ;;  %2390 = vmatprep.mubr.msk.f32.mxu1 %vm3283_vm0, %v3282_v1 }
  0x4e   :  { %2701 = vmatpush1.bf16.msra.mxu0 %v3371_v32  ;;  %2731 = vmatpush3.bf16.msra.mxu1 %v3374_v34 }
  0x4f   :  { %2703 = vmatprep.subr.bf16.mxu0 %v3377_v35  ;;  %2732 = vmatprep.subr.bf16.mxu1 %v3281_v0 }
  0x52   :  { %2705 = vmatpush1.bf16.msra.mxu0 %v3384_v41  ;;  %2734 = vmatpush3.bf16.msra.mxu1 %v3387_v43 }
  0x53   :  { %2707 = vmatprep.subr.bf16.mxu0 %v3390_v44  ;;  %2735 = vmatprep.subr.bf16.mxu1 %v3281_v0 }
  0x56   :  { %2709 = vmatpush1.bf16.msra.mxu0 %v3394_v50  ;;  %2737 = vmatpush3.bf16.msra.mxu1 %v3397_v52 }
  0x57   :  { %2711 = vmatprep.subr.bf16.mxu0 %v3400_v53  ;;  %2738 = vmatprep.subr.bf16.mxu1 %v3281_v0 }
  0x5a   :  { %2713 = vmatpush1.bf16.msra.mxu0 %v3404_v59  ;;  %2740 = vmatpush3.bf16.msra.mxu1 %v3407_v61 }
  0x5b   :  { %2715 = vmatprep.subr.bf16.mxu0 %v3410_v62  ;;  %2741 = vmatprep.subr.bf16.mxu1 %v3281_v0 }
  0x5e   :  { %2717 = vmatpush1.bf16.msra.mxu0 %v3414_v6  ;;  %2743 = vmatpush3.bf16.msra.mxu1 %v3417_v8 }
  0x5f   :  { %2719 = vmatprep.subr.bf16.mxu0 %v3420_v9  ;;  %2744 = vmatprep.subr.bf16.mxu1 %v3281_v0 }
  0x62   :  { %2721 = vmatpush1.bf16.msra.mxu0 %v3424_v15  ;;  %2746 = vmatpush3.bf16.msra.mxu1 %v3427_v18 }
  0x63   :  { %2723 = vmatprep.subr.bf16.mxu0 %v3430_v19  ;;  %2747 = vmatprep.subr.bf16.mxu1 %v3281_v0 }
  0x66   :  { %2725 = vmatpush1.bf16.msra.mxu0 %v3434_v24  ;;  %2749 = vmatpush3.bf16.msra.mxu1 %v3437_v27 }
  0x67   :  { %2751 = vmatprep.subr.bf16.mxu0 %v3357_v16  ;;  %2782 = vmatprep.subr.bf16.mxu1 %v3281_v0 }
  0x69   :  { %399 = vmatmul.mubr.f32.vlgmr.msra.gmra.mrb[2].mxu0 %v3442_v28  ;;  %2391 = vmatmul.mubr.f32.vlgmr.msra.gmra.mrb[2].mxu1 %v3442_v28 }
  0x6a   :  { %2753 = vmatpush1.bf16.msra.mxu0 %v3362_v23  ;;  %2784 = vmatpush3.bf16.msra.mxu1 %v3364_v25 }
  0x6b   :  { %2755 = vmatprep.subr.bf16.mxu0 %v3367_v26  ;;  %2785 = vmatprep.subr.bf16.mxu1 %v3281_v0 }
  0x6c   :  { %633 = vmatprep.mubr.f32.mxu0 %v3282_v1  ;;  %2425 = vmatprep.mubr.msk.f32.mxu1 %vm3283_vm0, %v3282_v1 }
  0x6e   :  { %2757 = vmatpush1.bf16.msra.mxu0 %v3371_v32  ;;  %2787 = vmatpush3.bf16.msra.mxu1 %v3374_v34 }
  0x6f   :  { %2759 = vmatprep.subr.bf16.mxu0 %v3377_v35  ;;  %2788 = vmatprep.subr.bf16.mxu1 %v3281_v0 }
  0x72   :  { %2761 = vmatpush1.bf16.msra.mxu0 %v3384_v41  ;;  %2790 = vmatpush3.bf16.msra.mxu1 %v3387_v43 }
  0x73   :  { %2763 = vmatprep.subr.bf16.mxu0 %v3390_v44  ;;  %2791 = vmatprep.subr.bf16.mxu1 %v3281_v0 }
  0x76   :  { %2765 = vmatpush1.bf16.msra.mxu0 %v3394_v50  ;;  %2793 = vmatpush3.bf16.msra.mxu1 %v3397_v52 }
  0x77   :  { %2767 = vmatprep.subr.bf16.mxu0 %v3400_v53  ;;  %2794 = vmatprep.subr.bf16.mxu1 %v3281_v0 }
  0x7a   :  { %2769 = vmatpush1.bf16.msra.mxu0 %v3404_v59  ;;  %2796 = vmatpush3.bf16.msra.mxu1 %v3407_v61 }
  0x7b   :  { %2771 = vmatprep.subr.bf16.mxu0 %v3410_v62  ;;  %2797 = vmatprep.subr.bf16.mxu1 %v3281_v0 }
  0x7e   :  { %2773 = vmatpush1.bf16.msra.mxu0 %v3414_v6  ;;  %2799 = vmatpush3.bf16.msra.mxu1 %v3417_v8 }
  0x7f   :  { %2775 = vmatprep.subr.bf16.mxu0 %v3420_v9  ;;  %2800 = vmatprep.subr.bf16.mxu1 %v3281_v0 }
  0x82   :  { %2777 = vmatpush1.bf16.msra.mxu0 %v3424_v15  ;;  %2802 = vmatpush3.bf16.msra.mxu1 %v3427_v18 }
  0x83   :  { %2779 = vmatprep.subr.bf16.mxu0 %v3430_v19  ;;  %2803 = vmatprep.subr.bf16.mxu1 %v3281_v0 }
  0x86   :  { %2781 = vmatpush1.bf16.msra.mxu0 %v3434_v24  ;;  %2805 = vmatpush3.bf16.msra.mxu1 %v3437_v27 }
  0x87   :  { %2807 = vmatprep.subr.bf16.mxu0 %v3357_v16  ;;  %2838 = vmatprep.subr.bf16.mxu1 %v3281_v0 }
 0x11c   :  { %v189_v42 = vpop.f32.mrb[0].mxu0  ;;  %v260_v45 = vpop.f32.mrb[0].mxu1 }
 0x11d   :  { %v190_v46 = vadd.f32 %v189_v42, %v111_v38  ;;  %v191_v47 = vpop.f32.mrb[1].mxu0  ;;  %v261_v48 = vadd.f32 %v260_v45, %v119_v39  ;;  %v2357_v49 = vpop.f32.mrb[1].mxu1 }
 0x11e   :  { %v192_v51 = vadd.f32 %v191_v47, %v115_v40 }
 0x11f   :  { %264 = vst [vmem:[#allocation3] sm:$0xff] %v190_v46  ;;  %266 = vst [vmem:[#allocation3 + $0x10] sm:$0xff] %v261_v48 }
 0x120   :  { %265 = vst [vmem:[#allocation3 + $0x8] sm:$0xff] %v192_v51 }
 0x127   :  { %v268_v60 = vld [vmem:[#allocation3] ss:$8 sm:$0x7] }
 0x128   :  { %v483_v7 = vrot.slane %v268_v60, 1  ;;  %v493_v36 = vrot.slane %v268_v60, 2 }
 0x13c   :  { %v400_v57 = vpop.f32.mrb[2].mxu0  ;;  %v471_v58 = vpop.f32.mrb[2].mxu1 }
 0x13d   :  { %v401_v63 = vadd.f32 %v400_v57, %v322_v55  ;;  %v402_v2 = vpop.f32.mrb[3].mxu0  ;;  %v2392_v3 = vpop.f32.mrb[3].mxu1  ;;  %v472_v22 = vadd.f32 %v471_v58, %v330_v17  ;;  %v503_v55 = vld [vmem:[#allocation3 + $0x1] ss:$8 sm:$0x7] }
 0x13e   :  { %v403_v4 = vadd.f32 %v402_v2, %v326_v56  ;;  %v718_v2 = vrot.slane %v503_v55, 1 }
 0x13f   :  { %v475_v5 = vadd.f32 %v401_v63, %v268_v60 }
 0x140   :  { %v485_v11 = vadd.f32 %v483_v7, %v403_v4 }
 0x141   :  { %v2154_v10 = vmul.f32 -1.442695, %v475_v5 }
 0x142   :  { %v2155_v12 = vmul.f32 -1.442695, %v485_v11 }
 0x143   :  { %3149 = vpow2.f32 %v2154_v10 }
 0x144   :  { %3151 = vpow2.f32 %v2155_v12 }
 0x14d   :  { %v3150_v13 = vpop.eup %3149 }
 0x14e   :  { %v479_v14 = vadd.f32 1.0, %v3150_v13  ;;  %v3152_v20 = vpop.eup %3151 }
 0x14f   :  { %v489_v21 = vadd.f32 1.0, %v3152_v20  ;;  %v728_v20 = vrot.slane %v503_v55, 2 }
 0x150   :  { %3153 = vrcp.f32 %v479_v14 }
 0x151   :  { %3155 = vrcp.f32 %v489_v21 }
 0x15a   :  { %v3154_v29 = vpop.eup %3153 }
 0x15b   :  { %v492_v30 = vmul.f32 %v3154_v29, %v472_v22  ;;  %v3156_v39 = vpop.eup %3155 }
 0x15c   :  { %v497_v40 = vsub.f32 1.0, %v3156_v39  ;;  %v499_v46 = vmul.f32 %v3156_v39, %v3442_v28  ;;  %v552_v28 = vld [vmem:[%s3865_s4] sm:$0x7] }
 0x15d   :  { %v495_v38 = vadd.f32 %v493_v36, %v492_v30  ;;  %v557_v48 = vrot.slane %v552_v28, %v3484_v31  ;;  %v561_v49 = vrot.slane %v552_v28, %v3491_v37  ;;  %v565_v11 = vrot.slane %v552_v28, %v3486_v33 }
 0x15f   :  { %3157 = vtanh.f32 %v495_v38 }
 0x169   :  { %v3158_v42 = vpop.eup %3157 }
 0x16a   :  { %v498_v45 = vmul.f32 %v3158_v42, %v497_v40 }
 0x16c   :  { %v3503_v47 = vadd.f32 %v499_v46, %v498_v45 }
 0x16e   :  { %501 = vst [vmem:[%s3867_s6] sm:$0x1] %v3503_v47  ;;  %634 = vmatmul.mubr.f32.vlgmr.msra.gmra.mrb[4].mxu0 %v3503_v47  ;;  %2426 = vmatmul.mubr.f32.vlgmr.msra.gmra.mrb[4].mxu1 %v3503_v47 }
 0x16f   :  { %2809 = vmatpush1.bf16.msra.mxu0 %v3362_v23  ;;  %2840 = vmatpush3.bf16.msra.mxu1 %v3364_v25 }
 0x170   :  { %2811 = vmatprep.subr.bf16.mxu0 %v3367_v26  ;;  %2841 = vmatprep.subr.bf16.mxu1 %v3281_v0 }
 0x171   :  { %868 = vmatprep.mubr.f32.mxu0 %v3282_v1  ;;  %2460 = vmatprep.mubr.msk.f32.mxu1 %vm3283_vm0, %v3282_v1 }
 0x173   :  { %2813 = vmatpush1.bf16.msra.mxu0 %v3371_v32  ;;  %2843 = vmatpush3.bf16.msra.mxu1 %v3374_v34 }
 0x174   :  { %2815 = vmatprep.subr.bf16.mxu0 %v3377_v35  ;;  %2844 = vmatprep.subr.bf16.mxu1 %v3281_v0 }
 0x177   :  { %2817 = vmatpush1.bf16.msra.mxu0 %v3384_v41  ;;  %2846 = vmatpush3.bf16.msra.mxu1 %v3387_v43 }
 0x178   :  { %2819 = vmatprep.subr.bf16.mxu0 %v3390_v44  ;;  %2847 = vmatprep.subr.bf16.mxu1 %v3281_v0 }
 0x17b   :  { %2821 = vmatpush1.bf16.msra.mxu0 %v3394_v50  ;;  %2849 = vmatpush3.bf16.msra.mxu1 %v3397_v52 }
 0x17c   :  { %2823 = vmatprep.subr.bf16.mxu0 %v3400_v53  ;;  %2850 = vmatprep.subr.bf16.mxu1 %v3281_v0 }
 0x17f   :  { %2825 = vmatpush1.bf16.msra.mxu0 %v3404_v59  ;;  %2852 = vmatpush3.bf16.msra.mxu1 %v3407_v61 }
 0x180   :  { %2827 = vmatprep.subr.bf16.mxu0 %v3410_v62  ;;  %2853 = vmatprep.subr.bf16.mxu1 %v3281_v0 }
 0x183   :  { %2829 = vmatpush1.bf16.msra.mxu0 %v3414_v6  ;;  %2855 = vmatpush3.bf16.msra.mxu1 %v3417_v8 }
 0x184   :  { %2831 = vmatprep.subr.bf16.mxu0 %v3420_v9  ;;  %2856 = vmatprep.subr.bf16.mxu1 %v3281_v0 }
 0x187   :  { %2833 = vmatpush1.bf16.msra.mxu0 %v3424_v15  ;;  %2858 = vmatpush3.bf16.msra.mxu1 %v3427_v18 }
 0x188   :  { %2835 = vmatprep.subr.bf16.mxu0 %v3430_v19  ;;  %2859 = vmatprep.subr.bf16.mxu1 %v3281_v0 }
 0x18b   :  { %2837 = vmatpush1.bf16.msra.mxu0 %v3434_v24  ;;  %2861 = vmatpush3.bf16.msra.mxu1 %v3437_v27 }
 0x18c   :  { %2863 = vmatprep.subr.bf16.mxu0 %v3357_v16  ;;  %2894 = vmatprep.subr.bf16.mxu1 %v3281_v0 }
 0x241   :  { %v635_v51 = vpop.f32.mrb[4].mxu0  ;;  %v706_v54 = vpop.f32.mrb[4].mxu1 }
 0x242   :  { %v636_v56 = vadd.f32 %v635_v51, %v557_v48  ;;  %v637_v57 = vpop.f32.mrb[5].mxu0  ;;  %v2427_v58 = vpop.f32.mrb[5].mxu1  ;;  %v707_v13 = vadd.f32 %v706_v54, %v565_v11  ;;  %v1210_v51 = vld [vmem:[#allocation6 + $0x8] sm:$0xff]  ;;  %v1213_v54 = vld [vmem:[#allocation6 + $0x20] sm:$0xff] }
 0x243   :  { %v638_v60 = vadd.f32 %v637_v57, %v561_v49  ;;  %v1212_v57 = vld [vmem:[#allocation6 + $0x18] sm:$0xff]  ;;  %v1211_v58 = vld [vmem:[#allocation6 + $0x10] sm:$0xff] }
 0x244   :  { %v710_v63 = vadd.f32 %v636_v56, %v503_v55  ;;  %v3613_v55 = vpack.c.bf16 %v1213_v54, %v1210_v51  ;;  %v1209_v56 = vld [vmem:[#allocation6] sm:$0xff]  ;;  %v1248_v51 = vld [vmem:[#allocation6 + $0x138] sm:$0xff]  ;;  %v1247_v54 = vld [vmem:[#allocation6 + $0x130] sm:$0xff] }
 0x245   :  { %v720_v3 = vadd.f32 %v718_v2, %v638_v60  ;;  %v3615_v60 = vpack.c.bf16 %v1212_v57, %v1209_v56  ;;  %v1250_v56 = vld [vmem:[#allocation6 + $0x148] sm:$0xff]  ;;  %v1252_v57 = vld [vmem:[#allocation6 + $0x158] sm:$0xff] }
 0x246   :  { %v2156_v16 = vmul.f32 -1.442695, %v710_v63  ;;  %v1214_v63 = vld [vmem:[#allocation6 + $0x28] sm:$0xff] }
 0x247   :  { %v2157_v4 = vmul.f32 -1.442695, %v720_v3  ;;  %v3618_v2 = vpack.c.bf16 %v1214_v63, %v1211_v58  ;;  %v1219_v3 = vld [vmem:[#allocation6 + $0x50] sm:$0xff] }
 0x248   :  { %3159 = vpow2.f32 %v2156_v16  ;;  %v1216_v16 = vld [vmem:[#allocation6 + $0x38] sm:$0xff]  ;;  %v1255_v58 = vld [vmem:[#allocation6 + $0x170] sm:$0xff] }
 0x249   :  { %3161 = vpow2.f32 %v2157_v4  ;;  %v3622_v4 = vpack.c.bf16 %v1219_v3, %v1216_v16  ;;  %v3677_v16 = vpack.c.bf16 %v1250_v56, %v1247_v54  ;;  %v3679_v3 = vpack.c.bf16 %v1255_v58, %v1252_v57 }
 0x252   :  { %v3160_v5 = vpop.eup %3159 }
 0x253   :  { %v714_v7 = vadd.f32 1.0, %v3160_v5  ;;  %v3162_v10 = vpop.eup %3161  ;;  %v1215_v5 = vld [vmem:[#allocation6 + $0x30] sm:$0xff] }
 0x254   :  { %v724_v12 = vadd.f32 1.0, %v3162_v10  ;;  %v1217_v10 = vld [vmem:[#allocation6 + $0x40] sm:$0xff] }
 0x255   :  { %3163 = vrcp.f32 %v714_v7  ;;  %v1218_v7 = vld [vmem:[#allocation6 + $0x48] sm:$0xff] }
 0x256   :  { %3165 = vrcp.f32 %v724_v12  ;;  %v3625_v11 = vpack.c.bf16 %v1218_v7, %v1215_v5  ;;  %v1220_v12 = vld [vmem:[#allocation6 + $0x58] sm:$0xff]  ;;  %v1251_v5 = vld [vmem:[#allocation6 + $0x150] sm:$0xff]  ;;  %v1254_v7 = vld [vmem:[#allocation6 + $0x168] sm:$0xff] }
 0x25f   :  { %v3164_v14 = vpop.eup %3163 }
 0x260   :  { %v727_v17 = vmul.f32 %v3164_v14, %v707_v13  ;;  %v3166_v22 = vpop.eup %3165  ;;  %v3628_v13 = vpack.c.bf16 %v1220_v12, %v1217_v10  ;;  %v1222_v14 = vld [vmem:[#allocation6 + $0x68] sm:$0xff]  ;;  %v1253_v10 = vld [vmem:[#allocation6 + $0x160] sm:$0xff]  ;;  %v1256_v12 = vld [vmem:[#allocation6 + $0x178] sm:$0xff] }
 0x261   :  { %v732_v29 = vsub.f32 1.0, %v3166_v22  ;;  %v734_v38 = vmul.f32 %v3166_v22, %v3503_v47  ;;  %v1224_v22 = vld [vmem:[#allocation6 + $0x78] sm:$0xff] }
 0x262   :  { %v730_v21 = vadd.f32 %v728_v20, %v727_v17  ;;  %v1225_v17 = vld [vmem:[#allocation6 + $0x80] sm:$0xff] }
 0x263   :  { %v3632_v20 = vpack.c.bf16 %v1225_v17, %v1222_v14  ;;  %v3683_v14 = vpack.c.bf16 %v1254_v7, %v1251_v5  ;;  %v3687_v17 = vpack.c.bf16 %v1256_v12, %v1253_v10 }
 0x264   :  { %3167 = vtanh.f32 %v730_v21  ;;  %v1221_v21 = vld [vmem:[#allocation6 + $0x60] sm:$0xff] }
 0x26e   :  { %v3168_v30 = vpop.eup %3167 }
 0x26f   :  { %v733_v36 = vmul.f32 %v3168_v30, %v732_v29  ;;  %v1223_v29 = vld [vmem:[#allocation6 + $0x70] sm:$0xff]  ;;  %v3635_v30 = vpack.c.bf16 %v1224_v22, %v1221_v21 }
 0x270   :  { %v1022_v21 = vld [vmem:[%s3865_s4] sm:$0x7] }
 0x271   :  { %v3553_v39 = vadd.f32 %v734_v38, %v733_v36  ;;  %v1226_v36 = vld [vmem:[#allocation6 + $0x88] sm:$0xff]  ;;  %v1027_v22 = vrot.slane %v1022_v21, %v3484_v31 }
 0x272   :  { %v3638_v38 = vpack.c.bf16 %v1226_v36, %v1223_v29  ;;  %v1031_v29 = vrot.slane %v1022_v21, %v3491_v37 }
 0x273   :  { %736 = vst [vmem:[%s3867_s6 + $0x1] sm:$0x1] %v3553_v39  ;;  %869 = vmatmul.mubr.f32.vlgmr.msra.gmra.mrb[6].mxu0 %v3553_v39  ;;  %2461 = vmatmul.mubr.f32.vlgmr.msra.gmra.mrb[6].mxu1 %v3553_v39 }
 0x274   :  { %2865 = vmatpush1.bf16.msra.mxu0 %v3362_v23  ;;  %2896 = vmatpush3.bf16.msra.mxu1 %v3364_v25  ;;  %v787_v23 = vld [vmem:[%s3865_s4] sm:$0x7] }
 0x275   :  { %2867 = vmatprep.subr.bf16.mxu0 %v3367_v26  ;;  %2897 = vmatprep.subr.bf16.mxu1 %v3281_v0  ;;  %v792_v25 = vrot.slane %v787_v23, %v3484_v31  ;;  %v796_v26 = vrot.slane %v787_v23, %v3491_v37 }
 0x276   :  { %1103 = vmatprep.mubr.f32.mxu0 %v3282_v1  ;;  %2495 = vmatprep.mubr.msk.f32.mxu1 %vm3283_vm0, %v3282_v1 }
 0x278   :  { %2869 = vmatpush1.bf16.msra.mxu0 %v3371_v32  ;;  %2899 = vmatpush3.bf16.msra.mxu1 %v3374_v34 }
 0x279   :  { %2871 = vmatprep.subr.bf16.mxu0 %v3377_v35  ;;  %2900 = vmatprep.subr.bf16.mxu1 %v3281_v0  ;;  %v738_v35 = vld [vmem:[#allocation3 + $0x2] ss:$8 sm:$0x7] }
 0x27a   :  { %v963_v40 = vrot.slane %v738_v35, 2 }
 0x27c   :  { %2873 = vmatpush1.bf16.msra.mxu0 %v3384_v41  ;;  %2902 = vmatpush3.bf16.msra.mxu1 %v3387_v43 }
 0x27d   :  { %2875 = vmatprep.subr.bf16.mxu0 %v3390_v44  ;;  %2903 = vmatprep.subr.bf16.mxu1 %v3281_v0 }
 0x280   :  { %2877 = vmatpush1.bf16.msra.mxu0 %v3394_v50  ;;  %2905 = vmatpush3.bf16.msra.mxu1 %v3397_v52 }
 0x281   :  { %2879 = vmatprep.subr.bf16.mxu0 %v3400_v53  ;;  %2906 = vmatprep.subr.bf16.mxu1 %v3281_v0  ;;  %v953_v53 = vrot.slane %v738_v35, 1 }
 0x284   :  { %2881 = vmatpush1.bf16.msra.mxu0 %v3404_v59  ;;  %2908 = vmatpush3.bf16.msra.mxu1 %v3407_v61 }
 0x285   :  { %2883 = vmatprep.subr.bf16.mxu0 %v3410_v62  ;;  %2909 = vmatprep.subr.bf16.mxu1 %v3281_v0 }
 0x288   :  { %2885 = vmatpush1.bf16.msra.mxu0 %v3414_v6  ;;  %2911 = vmatpush3.bf16.msra.mxu1 %v3417_v8 }
 0x289   :  { %2887 = vmatprep.subr.bf16.mxu0 %v3420_v9  ;;  %2912 = vmatprep.subr.bf16.mxu1 %v3281_v0 }
 0x28c   :  { %2889 = vmatpush1.bf16.msra.mxu0 %v3424_v15  ;;  %2914 = vmatpush3.bf16.msra.mxu1 %v3427_v18  ;;  %v800_v15 = vrot.slane %v787_v23, %v3486_v33  ;;  %v1231_v23 = vld [vmem:[#allocation6 + $0xb0] sm:$0xff] }
 0x28d   :  { %2891 = vmatprep.subr.bf16.mxu0 %v3430_v19  ;;  %2915 = vmatprep.subr.bf16.mxu1 %v3281_v0 }
 0x290   :  { %2893 = vmatpush1.bf16.msra.mxu0 %v3434_v24  ;;  %2917 = vmatpush3.bf16.msra.mxu1 %v3437_v27 }
 0x291   :  { %2950 = vmatprep.subr.bf16.mxu1 %v3281_v0  ;;  %2919 = vmatprep.subr.bf16.mxu0 %v3613_v55 }
 0x346   :  { %v870_v32 = vpop.f32.mrb[6].mxu0  ;;  %v941_v34 = vpop.f32.mrb[6].mxu1 }
 0x347   :  { %v871_v41 = vadd.f32 %v870_v32, %v792_v25  ;;  %v872_v43 = vpop.f32.mrb[7].mxu0  ;;  %v2462_v44 = vpop.f32.mrb[7].mxu1  ;;  %v942_v19 = vadd.f32 %v941_v34, %v800_v15  ;;  %v1230_v32 = vld [vmem:[#allocation6 + $0xa8] sm:$0xff]  ;;  %v1229_v34 = vld [vmem:[#allocation6 + $0xa0] sm:$0xff] }
 0x348   :  { %v873_v50 = vadd.f32 %v872_v43, %v796_v26  ;;  %v1227_v26 = vld [vmem:[#allocation6 + $0x90] sm:$0xff]  ;;  %v1234_v44 = vld [vmem:[#allocation6 + $0xc8] sm:$0xff] }
 0x349   :  { %v945_v52 = vadd.f32 %v871_v41, %v738_v35  ;;  %v3645_v35 = vpack.c.bf16 %v1230_v32, %v1227_v26  ;;  %v1232_v41 = vld [vmem:[#allocation6 + $0xb8] sm:$0xff] }
 0x34a   :  { %v955_v61 = vadd.f32 %v953_v53, %v873_v50  ;;  %v3648_v43 = vpack.c.bf16 %v1232_v41, %v1229_v34  ;;  %v1237_v50 = vld [vmem:[#allocation6 + $0xe0] sm:$0xff] }
 0x34b   :  { %v2158_v59 = vmul.f32 -1.442695, %v945_v52  ;;  %v3652_v52 = vpack.c.bf16 %v1237_v50, %v1234_v44  ;;  %v1233_v53 = vld [vmem:[#allocation6 + $0xc0] sm:$0xff] }
 0x34c   :  { %v2159_v62 = vmul.f32 -1.442695, %v955_v61  ;;  %v1235_v61 = vld [vmem:[#allocation6 + $0xd0] sm:$0xff] }
 0x34d   :  { %3169 = vpow2.f32 %v2158_v59  ;;  %v1236_v59 = vld [vmem:[#allocation6 + $0xd8] sm:$0xff] }
 0x34e   :  { %3171 = vpow2.f32 %v2159_v62  ;;  %v3655_v62 = vpack.c.bf16 %v1236_v59, %v1233_v53 }
 0x357   :  { %v3170_v6 = vpop.eup %3169 }
 0x358   :  { %v949_v8 = vadd.f32 1.0, %v3170_v6  ;;  %v3172_v9 = vpop.eup %3171  ;;  %v1238_v6 = vld [vmem:[#allocation6 + $0xe8] sm:$0xff] }
 0x359   :  { %v959_v18 = vadd.f32 1.0, %v3172_v9  ;;  %v1243_v9 = vld [vmem:[#allocation6 + $0x110] sm:$0xff]  ;;  %v3658_v15 = vpack.c.bf16 %v1238_v6, %v1235_v61 }
 0x35a   :  { %3173 = vrcp.f32 %v949_v8  ;;  %v1240_v8 = vld [vmem:[#allocation6 + $0xf8] sm:$0xff] }
 0x35b   :  { %3175 = vrcp.f32 %v959_v18  ;;  %v3660_v18 = vpack.c.bf16 %v1243_v9, %v1240_v8 }
 0x364   :  { %v3174_v24 = vpop.eup %3173 }
 0x365   :  { %v962_v27 = vmul.f32 %v3174_v24, %v942_v19  ;;  %v3176_v45 = vpop.eup %3175  ;;  %v1239_v19 = vld [vmem:[#allocation6 + $0xf0] sm:$0xff]  ;;  %v1242_v24 = vld [vmem:[#allocation6 + $0x108] sm:$0xff] }
 0x366   :  { %v967_v46 = vsub.f32 1.0, %v3176_v45  ;;  %v969_v48 = vmul.f32 %v3176_v45, %v3553_v39  ;;  %v1228_v39 = vld [vmem:[#allocation6 + $0x98] sm:$0xff]  ;;  %v1246_v45 = vld [vmem:[#allocation6 + $0x128] sm:$0xff] }
 0x367   :  { %v965_v42 = vadd.f32 %v963_v40, %v962_v27  ;;  %v3642_v25 = vpack.c.bf16 %v1231_v23, %v1228_v39  ;;  %v1241_v27 = vld [vmem:[#allocation6 + $0x100] sm:$0xff]  ;;  %v3663_v40 = vpack.c.bf16 %v1242_v24, %v1239_v19  ;;  %v973_v23 = vld [vmem:[#allocation3 + $0x3] ss:$8 sm:$0x7]  ;;  %v1035_v19 = vrot.slane %v1022_v21, %v3486_v33 }
 0x368   :  { %v1188_v50 = vrot.slane %v973_v23, 1 }
 0x369   :  { %3177 = vtanh.f32 %v965_v42  ;;  %v1244_v42 = vld [vmem:[#allocation6 + $0x118] sm:$0xff] }
 0x373   :  { %v3178_v47 = vpop.eup %3177 }
 0x374   :  { %v968_v28 = vmul.f32 %v3178_v47, %v967_v46  ;;  %v1249_v46 = vld [vmem:[#allocation6 + $0x140] sm:$0xff]  ;;  %v3667_v47 = vpack.c.bf16 %v1244_v42, %v1241_v27 }
 0x376   :  { %v3602_v49 = vadd.f32 %v969_v48, %v968_v28  ;;  %v3669_v28 = vpack.c.bf16 %v1249_v46, %v1246_v45  ;;  %v1245_v48 = vld [vmem:[#allocation6 + $0x120] sm:$0xff]  ;;  %v1198_v46 = vrot.slane %v973_v23, 2 }
 0x377   :  { %v3673_v63 = vpack.c.bf16 %v1248_v51, %v1245_v48 }
 0x378   :  { %971 = vst [vmem:[%s3867_s6 + $0x2] sm:$0x1] %v3602_v49  ;;  %1104 = vmatmul.mubr.f32.vlgmr.msra.gmra.mrb[8].mxu0 %v3602_v49  ;;  %2496 = vmatmul.mubr.f32.vlgmr.msra.gmra.mrb[8].mxu1 %v3602_v49 }
 0x379   :  { %1338 = vmatprep.mubr.f32.mxu0 %v3282_v1  ;;  %2530 = vmatprep.mubr.msk.f32.mxu1 %vm3283_vm0, %v3282_v1 }
 0x37a   :  { %2921 = vmatpush1.bf16.msra.mxu0 %v3615_v60  ;;  %2952 = vmatpush3.bf16.msra.mxu1 %v3618_v2 }
 0x37b   :  { %2953 = vmatprep.subr.bf16.mxu1 %v3281_v0  ;;  %2923 = vmatprep.subr.bf16.mxu0 %v3622_v4 }
 0x37e   :  { %2925 = vmatpush1.bf16.msra.mxu0 %v3625_v11  ;;  %2955 = vmatpush3.bf16.msra.mxu1 %v3628_v13 }
 0x37f   :  { %2956 = vmatprep.subr.bf16.mxu1 %v3281_v0  ;;  %2927 = vmatprep.subr.bf16.mxu0 %v3632_v20 }
 0x382   :  { %2929 = vmatpush1.bf16.msra.mxu0 %v3635_v30  ;;  %2958 = vmatpush3.bf16.msra.mxu1 %v3638_v38 }
 0x383   :  { %2959 = vmatprep.subr.bf16.mxu1 %v3281_v0  ;;  %2931 = vmatprep.subr.bf16.mxu0 %v3642_v25 }
 0x386   :  { %2933 = vmatpush1.bf16.msra.mxu0 %v3645_v35  ;;  %2961 = vmatpush3.bf16.msra.mxu1 %v3648_v43 }
 0x387   :  { %2962 = vmatprep.subr.bf16.mxu1 %v3281_v0  ;;  %2935 = vmatprep.subr.bf16.mxu0 %v3652_v52 }
 0x38a   :  { %2937 = vmatpush1.bf16.msra.mxu0 %v3655_v62  ;;  %2964 = vmatpush3.bf16.msra.mxu1 %v3658_v15 }
 0x38b   :  { %2939 = vmatprep.subr.bf16.mxu0 %v3660_v18  ;;  %2965 = vmatprep.subr.bf16.mxu1 %v3281_v0 }
 0x38e   :  { %2941 = vmatpush1.bf16.msra.mxu0 %v3663_v40  ;;  %2967 = vmatpush3.bf16.msra.mxu1 %v3667_v47 }
 0x38f   :  { %2943 = vmatprep.subr.bf16.mxu0 %v3669_v28  ;;  %2968 = vmatprep.subr.bf16.mxu1 %v3281_v0 }
 0x392   :  { %2945 = vmatpush1.bf16.msra.mxu0 %v3673_v63  ;;  %2970 = vmatpush3.bf16.msra.mxu1 %v3677_v16 }
 0x393   :  { %2947 = vmatprep.subr.bf16.mxu0 %v3679_v3  ;;  %2971 = vmatprep.subr.bf16.mxu1 %v3281_v0 }
 0x396   :  { %2949 = vmatpush1.bf16.msra.mxu0 %v3683_v14  ;;  %2973 = vmatpush3.bf16.msra.mxu1 %v3687_v17 }
 0x397   :  { %2975 = vmatprep.subr.bf16.mxu0 %v3613_v55  ;;  %3006 = vmatprep.subr.bf16.mxu1 %v3281_v0 }
 0x44b   :  { %v1105_v36 = vpop.f32.mrb[8].mxu0  ;;  %v1176_v39 = vpop.f32.mrb[8].mxu1 }
 0x44c   :  { %v1106_v26 = vadd.f32 %v1105_v36, %v1027_v22  ;;  %v1107_v32 = vpop.f32.mrb[9].mxu0  ;;  %v2497_v34 = vpop.f32.mrb[9].mxu1  ;;  %v1177_v27 = vadd.f32 %v1176_v39, %v1035_v19  ;;  %v1208_v22 = vld [vmem:[#allocation3 + $0x4] ss:$8 sm:$0x7] }
 0x44d   :  { %v1108_v41 = vadd.f32 %v1107_v32, %v1031_v29  ;;  %v1423_v32 = vrot.slane %v1208_v22, 1 }
 0x44e   :  { %v1180_v44 = vadd.f32 %v1106_v26, %v973_v23 }
 0x44f   :  { %v1190_v59 = vadd.f32 %v1188_v50, %v1108_v41 }
 0x450   :  { %v2160_v53 = vmul.f32 -1.442695, %v1180_v44 }
 0x451   :  { %v2161_v61 = vmul.f32 -1.442695, %v1190_v59 }
 0x452   :  { %3179 = vpow2.f32 %v2160_v53 }
 0x453   :  { %3181 = vpow2.f32 %v2161_v61 }
 0x45c   :  { %v3180_v6 = vpop.eup %3179 }
 0x45d   :  { %v1184_v8 = vadd.f32 1.0, %v3180_v6  ;;  %v3182_v9 = vpop.eup %3181 }
 0x45e   :  { %v1194_v24 = vadd.f32 1.0, %v3182_v9 }
 0x45f   :  { %3183 = vrcp.f32 %v1184_v8 }
 0x460   :  { %3185 = vrcp.f32 %v1194_v24  ;;  %v1433_v24 = vrot.slane %v1208_v22, 2 }
 0x469   :  { %v3184_v42 = vpop.eup %3183 }
 0x46a   :  { %v1197_v45 = vmul.f32 %v3184_v42, %v1177_v27  ;;  %v3186_v51 = vpop.eup %3185 }
 0x46b   :  { %v1202_v54 = vsub.f32 1.0, %v3186_v51  ;;  %v1204_v58 = vmul.f32 %v3186_v51, %v3602_v49  ;;  %v1257_v49 = vld [vmem:[%s3865_s4] sm:$0x7] }
 0x46c   :  { %v1200_v48 = vadd.f32 %v1198_v46, %v1197_v45  ;;  %v1262_v7 = vrot.slane %v1257_v49, %v3484_v31  ;;  %v1266_v10 = vrot.slane %v1257_v49, %v3491_v37  ;;  %v1270_v61 = vrot.slane %v1257_v49, %v3486_v33 }
 0x46e   :  { %3187 = vtanh.f32 %v1200_v48 }
 0x478   :  { %v3188_v56 = vpop.eup %3187 }
 0x479   :  { %v1203_v57 = vmul.f32 %v3188_v56, %v1202_v54  ;;  %v1492_v56 = vld [vmem:[%s3865_s4] sm:$0x7] }
 0x47b   :  { %v3701_v5 = vadd.f32 %v1204_v58, %v1203_v57  ;;  %v1497_v57 = vrot.slane %v1492_v56, %v3484_v31  ;;  %v1501_v58 = vrot.slane %v1492_v56, %v3491_v37 }
 0x47d   :  { %1206 = vst [vmem:[%s3867_s6 + $0x3] sm:$0x1] %v3701_v5  ;;  %1339 = vmatmul.mubr.f32.vlgmr.msra.gmra.mrb[10].mxu0 %v3701_v5  ;;  %2531 = vmatmul.mubr.f32.vlgmr.msra.gmra.mrb[10].mxu1 %v3701_v5 }
 0x47e   :  { %2977 = vmatpush1.bf16.msra.mxu0 %v3615_v60  ;;  %3008 = vmatpush3.bf16.msra.mxu1 %v3618_v2 }
 0x47f   :  { %2979 = vmatprep.subr.bf16.mxu0 %v3622_v4  ;;  %3009 = vmatprep.subr.bf16.mxu1 %v3281_v0 }
 0x480   :  { %1573 = vmatprep.mubr.f32.mxu0 %v3282_v1  ;;  %2565 = vmatprep.mubr.msk.f32.mxu1 %vm3283_vm0, %v3282_v1 }
 0x482   :  { %2981 = vmatpush1.bf16.msra.mxu0 %v3625_v11  ;;  %3011 = vmatpush3.bf16.msra.mxu1 %v3628_v13 }
 0x483   :  { %2983 = vmatprep.subr.bf16.mxu0 %v3632_v20  ;;  %3012 = vmatprep.subr.bf16.mxu1 %v3281_v0 }
 0x486   :  { %2985 = vmatpush1.bf16.msra.mxu0 %v3635_v30  ;;  %3014 = vmatpush3.bf16.msra.mxu1 %v3638_v38 }
 0x487   :  { %2987 = vmatprep.subr.bf16.mxu0 %v3642_v25  ;;  %3015 = vmatprep.subr.bf16.mxu1 %v3281_v0 }
 0x48a   :  { %2989 = vmatpush1.bf16.msra.mxu0 %v3645_v35  ;;  %3017 = vmatpush3.bf16.msra.mxu1 %v3648_v43 }
 0x48b   :  { %2991 = vmatprep.subr.bf16.mxu0 %v3652_v52  ;;  %3018 = vmatprep.subr.bf16.mxu1 %v3281_v0 }
 0x48e   :  { %2993 = vmatpush1.bf16.msra.mxu0 %v3655_v62  ;;  %3020 = vmatpush3.bf16.msra.mxu1 %v3658_v15 }
 0x48f   :  { %2995 = vmatprep.subr.bf16.mxu0 %v3660_v18  ;;  %3021 = vmatprep.subr.bf16.mxu1 %v3281_v0 }
 0x492   :  { %2997 = vmatpush1.bf16.msra.mxu0 %v3663_v40  ;;  %3023 = vmatpush3.bf16.msra.mxu1 %v3667_v47 }
 0x493   :  { %2999 = vmatprep.subr.bf16.mxu0 %v3669_v28  ;;  %3024 = vmatprep.subr.bf16.mxu1 %v3281_v0 }
 0x496   :  { %3001 = vmatpush1.bf16.msra.mxu0 %v3673_v63  ;;  %3026 = vmatpush3.bf16.msra.mxu1 %v3677_v16 }
 0x497   :  { %3003 = vmatprep.subr.bf16.mxu0 %v3679_v3  ;;  %3027 = vmatprep.subr.bf16.mxu1 %v3281_v0 }
 0x49a   :  { %3005 = vmatpush1.bf16.msra.mxu0 %v3683_v14  ;;  %3029 = vmatpush3.bf16.msra.mxu1 %v3687_v17 }
 0x49b   :  { %3031 = vmatprep.subr.bf16.mxu0 %v3613_v55  ;;  %3062 = vmatprep.subr.bf16.mxu1 %v3281_v0 }
 0x550   :  { %v1340_v12 = vpop.f32.mrb[10].mxu0  ;;  %v1411_v21 = vpop.f32.mrb[10].mxu1 }
 0x551   :  { %v1341_v29 = vadd.f32 %v1340_v12, %v1262_v7  ;;  %v1342_v36 = vpop.f32.mrb[11].mxu0  ;;  %v2532_v39 = vpop.f32.mrb[11].mxu1  ;;  %v1412_v8 = vadd.f32 %v1411_v21, %v1270_v61  ;;  %v1443_v7 = vld [vmem:[#allocation3 + $0x5] ss:$8 sm:$0x7] }
 0x552   :  { %v1343_v23 = vadd.f32 %v1342_v36, %v1266_v10  ;;  %v1658_v36 = vrot.slane %v1443_v7, 1  ;;  %v1668_v61 = vrot.slane %v1443_v7, 2 }
 0x553   :  { %v1415_v26 = vadd.f32 %v1341_v29, %v1208_v22 }
 0x554   :  { %v1425_v41 = vadd.f32 %v1423_v32, %v1343_v23 }
 0x555   :  { %v2162_v34 = vmul.f32 -1.442695, %v1415_v26 }
 0x556   :  { %v2163_v44 = vmul.f32 -1.442695, %v1425_v41  ;;  %v1505_v41 = vrot.slane %v1492_v56, %v3486_v33 }
 0x557   :  { %3189 = vpow2.f32 %v2162_v34 }
 0x558   :  { %3191 = vpow2.f32 %v2163_v44 }
 0x561   :  { %v3190_v50 = vpop.eup %3189 }
 0x562   :  { %v1419_v53 = vadd.f32 1.0, %v3190_v50  ;;  %v3192_v59 = vpop.eup %3191 }
 0x563   :  { %v1429_v6 = vadd.f32 1.0, %v3192_v59 }
 0x564   :  { %3193 = vrcp.f32 %v1419_v53 }
 0x565   :  { %3195 = vrcp.f32 %v1429_v6 }
 0x56e   :  { %v3194_v9 = vpop.eup %3193 }
 0x56f   :  { %v1432_v19 = vmul.f32 %v3194_v9, %v1412_v8  ;;  %v3196_v42 = vpop.eup %3195 }
 0x570   :  { %v1437_v45 = vsub.f32 1.0, %v3196_v42  ;;  %v1439_v51 = vmul.f32 %v3196_v42, %v3701_v5 }
 0x571   :  { %v1435_v27 = vadd.f32 %v1433_v24, %v1432_v19 }
 0x573   :  { %3197 = vtanh.f32 %v1435_v27 }
 0x57d   :  { %v3198_v46 = vpop.eup %3197 }
 0x57e   :  { %v1438_v48 = vmul.f32 %v3198_v46, %v1437_v45 }
 0x580   :  { %v3751_v54 = vadd.f32 %v1439_v51, %v1438_v48 }
 0x582   :  { %1441 = vst [vmem:[%s3867_s6 + $0x4] sm:$0x1] %v3751_v54  ;;  %1574 = vmatmul.mubr.f32.vlgmr.msra.gmra.mrb[12].mxu0 %v3751_v54  ;;  %2566 = vmatmul.mubr.f32.vlgmr.msra.gmra.mrb[12].mxu1 %v3751_v54 }
 0x583   :  { %3033 = vmatpush1.bf16.msra.mxu0 %v3615_v60  ;;  %3064 = vmatpush3.bf16.msra.mxu1 %v3618_v2 }
 0x584   :  { %3035 = vmatprep.subr.bf16.mxu0 %v3622_v4  ;;  %3065 = vmatprep.subr.bf16.mxu1 %v3281_v0 }
 0x585   :  { %1808 = vmatprep.mubr.f32.mxu0 %v3282_v1  ;;  %2600 = vmatprep.mubr.msk.f32.mxu1 %vm3283_vm0, %v3282_v1 }
 0x587   :  { %3037 = vmatpush1.bf16.msra.mxu0 %v3625_v11  ;;  %3067 = vmatpush3.bf16.msra.mxu1 %v3628_v13 }
 0x588   :  { %3039 = vmatprep.subr.bf16.mxu0 %v3632_v20  ;;  %3068 = vmatprep.subr.bf16.mxu1 %v3281_v0 }
 0x58b   :  { %3041 = vmatpush1.bf16.msra.mxu0 %v3635_v30  ;;  %3070 = vmatpush3.bf16.msra.mxu1 %v3638_v38 }
 0x58c   :  { %3043 = vmatprep.subr.bf16.mxu0 %v3642_v25  ;;  %3071 = vmatprep.subr.bf16.mxu1 %v3281_v0 }
 0x58f   :  { %3045 = vmatpush1.bf16.msra.mxu0 %v3645_v35  ;;  %3073 = vmatpush3.bf16.msra.mxu1 %v3648_v43 }
 0x590   :  { %3047 = vmatprep.subr.bf16.mxu0 %v3652_v52  ;;  %3074 = vmatprep.subr.bf16.mxu1 %v3281_v0 }
 0x593   :  { %3049 = vmatpush1.bf16.msra.mxu0 %v3655_v62  ;;  %3076 = vmatpush3.bf16.msra.mxu1 %v3658_v15 }
 0x594   :  { %3051 = vmatprep.subr.bf16.mxu0 %v3660_v18  ;;  %3077 = vmatprep.subr.bf16.mxu1 %v3281_v0 }
 0x597   :  { %3053 = vmatpush1.bf16.msra.mxu0 %v3663_v40  ;;  %3079 = vmatpush3.bf16.msra.mxu1 %v3667_v47 }
 0x598   :  { %3055 = vmatprep.subr.bf16.mxu0 %v3669_v28  ;;  %3080 = vmatprep.subr.bf16.mxu1 %v3281_v0 }
 0x59b   :  { %3057 = vmatpush1.bf16.msra.mxu0 %v3673_v63  ;;  %3082 = vmatpush3.bf16.msra.mxu1 %v3677_v16 }
 0x59c   :  { %3059 = vmatprep.subr.bf16.mxu0 %v3679_v3  ;;  %3083 = vmatprep.subr.bf16.mxu1 %v3281_v0 }
 0x59f   :  { %3061 = vmatpush1.bf16.msra.mxu0 %v3683_v14  ;;  %3085 = vmatpush3.bf16.msra.mxu1 %v3687_v17 }
 0x5a0   :  { %3087 = vmatprep.subr.bf16.mxu0 %v3613_v55  ;;  %3118 = vmatprep.subr.bf16.mxu1 %v3281_v0 }
 0x655   :  { %v1575_v5 = vpop.f32.mrb[12].mxu0  ;;  %v1646_v49 = vpop.f32.mrb[12].mxu1 }
 0x656   :  { %v1576_v10 = vadd.f32 %v1575_v5, %v1497_v57  ;;  %v1577_v12 = vpop.f32.mrb[13].mxu0  ;;  %v2567_v21 = vpop.f32.mrb[13].mxu1  ;;  %v1647_v50 = vadd.f32 %v1646_v49, %v1505_v41  ;;  %v1962_v57 = vld [vmem:[%s3865_s4] sm:$0x7] }
 0x657   :  { %v1578_v22 = vadd.f32 %v1577_v12, %v1501_v58  ;;  %v1967_v58 = vrot.slane %v1962_v57, %v3484_v31  ;;  %v1971_v5 = vrot.slane %v1962_v57, %v3491_v37 }
 0x658   :  { %v1650_v29 = vadd.f32 %v1576_v10, %v1443_v7  ;;  %v1913_v10 = vld [vmem:[#allocation3 + $0x7] ss:$8 sm:$0x7] }
 0x659   :  { %v1660_v39 = vadd.f32 %v1658_v36, %v1578_v22 }
 0x65a   :  { %v2164_v55 = vmul.f32 -1.442695, %v1650_v29 }
 0x65b   :  { %v2165_v23 = vmul.f32 -1.442695, %v1660_v39 }
 0x65c   :  { %3199 = vpow2.f32 %v2164_v55  ;;  %v2128_v55 = vrot.slane %v1913_v10, 1 }
 0x65d   :  { %3201 = vpow2.f32 %v2165_v23 }
 0x666   :  { %v3200_v26 = vpop.eup %3199 }
 0x667   :  { %v1654_v32 = vadd.f32 1.0, %v3200_v26  ;;  %v3202_v34 = vpop.eup %3201 }
 0x668   :  { %v1664_v44 = vadd.f32 1.0, %v3202_v34 }
 0x669   :  { %3203 = vrcp.f32 %v1654_v32 }
 0x66a   :  { %3205 = vrcp.f32 %v1664_v44 }
 0x673   :  { %v3204_v53 = vpop.eup %3203 }
 0x674   :  { %v1667_v59 = vmul.f32 %v3204_v53, %v1647_v50  ;;  %v3206_v8 = vpop.eup %3205 }
 0x675   :  { %v1672_v9 = vsub.f32 1.0, %v3206_v8  ;;  %v1674_v27 = vmul.f32 %v3206_v8, %v3751_v54 }
 0x676   :  { %v1670_v6 = vadd.f32 %v1668_v61, %v1667_v59  ;;  %v2138_v59 = vrot.slane %v1913_v10, 2 }
 0x678   :  { %3207 = vtanh.f32 %v1670_v6 }
 0x682   :  { %v3208_v19 = vpop.eup %3207 }
 0x683   :  { %v1673_v24 = vmul.f32 %v3208_v19, %v1672_v9 }
 0x685   :  { %v3801_v42 = vadd.f32 %v1674_v27, %v1673_v24 }
 0x687   :  { %1676 = vst [vmem:[%s3867_s6 + $0x5] sm:$0x1] %v3801_v42  ;;  %1809 = vmatmul.mubr.f32.vlgmr.msra.gmra.mrb[14].mxu0 %v3801_v42  ;;  %2601 = vmatmul.mubr.f32.vlgmr.msra.gmra.mrb[14].mxu1 %v3801_v42 }
 0x688   :  { %3089 = vmatpush1.bf16.msra.mxu0 %v3615_v60  ;;  %3120 = vmatpush3.bf16.msra.mxu1 %v3618_v2 }
 0x689   :  { %3091 = vmatprep.subr.bf16.mxu0 %v3622_v4  ;;  %3121 = vmatprep.subr.bf16.mxu1 %v3281_v0 }
 0x68a   :  { %2043 = vmatprep.mubr.f32.mxu0 %v3282_v1  ;;  %2635 = vmatprep.mubr.msk.f32.mxu1 %vm3283_vm0, %v3282_v1  ;;  %v1727_v1 = vld [vmem:[%s3865_s4] sm:$0x7] }
 0x68b   :  { %v1732_v60 = vrot.slane %v1727_v1, %v3484_v31  ;;  %v1736_v2 = vrot.slane %v1727_v1, %v3491_v37  ;;  %v1975_v37 = vrot.slane %v1962_v57, %v3486_v33 }
 0x68c   :  { %3093 = vmatpush1.bf16.msra.mxu0 %v3625_v11  ;;  %3123 = vmatpush3.bf16.msra.mxu1 %v3628_v13  ;;  %v1678_v13 = vld [vmem:[#allocation3 + $0x6] ss:$8 sm:$0x7] }
 0x68d   :  { %3095 = vmatprep.subr.bf16.mxu0 %v3632_v20  ;;  %3124 = vmatprep.subr.bf16.mxu1 %v3281_v0 }
 0x690   :  { %3097 = vmatpush1.bf16.msra.mxu0 %v3635_v30  ;;  %3126 = vmatpush3.bf16.msra.mxu1 %v3638_v38 }
 0x691   :  { %3099 = vmatprep.subr.bf16.mxu0 %v3642_v25  ;;  %3127 = vmatprep.subr.bf16.mxu1 %v3281_v0 }
 0x694   :  { %3101 = vmatpush1.bf16.msra.mxu0 %v3645_v35  ;;  %3129 = vmatpush3.bf16.msra.mxu1 %v3648_v43  ;;  %v1893_v35 = vrot.slane %v1678_v13, 1 }
 0x695   :  { %3103 = vmatprep.subr.bf16.mxu0 %v3652_v52  ;;  %3130 = vmatprep.subr.bf16.mxu1 %v3281_v0 }
 0x698   :  { %3105 = vmatpush1.bf16.msra.mxu0 %v3655_v62  ;;  %3132 = vmatpush3.bf16.msra.mxu1 %v3658_v15 }
 0x699   :  { %3107 = vmatprep.subr.bf16.mxu0 %v3660_v18  ;;  %3133 = vmatprep.subr.bf16.mxu1 %v3281_v0 }
 0x69c   :  { %3109 = vmatpush1.bf16.msra.mxu0 %v3663_v40  ;;  %3135 = vmatpush3.bf16.msra.mxu1 %v3667_v47  ;;  %v1740_v47 = vrot.slane %v1727_v1, %v3486_v33 }
 0x69d   :  { %3111 = vmatprep.subr.bf16.mxu0 %v3669_v28  ;;  %3136 = vmatprep.subr.bf16.mxu1 %v3281_v0 }
 0x6a0   :  { %3113 = vmatpush1.bf16.msra.mxu0 %v3673_v63  ;;  %3138 = vmatpush3.bf16.msra.mxu1 %v3677_v16 }
 0x6a1   :  { %3115 = vmatprep.subr.bf16.mxu0 %v3679_v3  ;;  %3139 = vmatprep.subr.bf16.mxu1 %v3281_v0 }
 0x6a4   :  { %3117 = vmatpush1.bf16.msra.mxu0 %v3683_v14  ;;  %3141 = vmatpush3.bf16.msra.mxu1 %v3687_v17  ;;  %v1903_v14 = vrot.slane %v1678_v13, 2 }
 0x75a   :  { %v1810_v4 = vpop.f32.mrb[14].mxu0  ;;  %v1881_v11 = vpop.f32.mrb[14].mxu1 }
 0x75b   :  { %v1811_v20 = vadd.f32 %v1810_v4, %v1732_v60  ;;  %v1812_v30 = vpop.f32.mrb[15].mxu0  ;;  %v2602_v38 = vpop.f32.mrb[15].mxu1  ;;  %v1882_v63 = vadd.f32 %v1881_v11, %v1740_v47 }
 0x75c   :  { %v1813_v25 = vadd.f32 %v1812_v30, %v1736_v2 }
 0x75d   :  { %v1885_v0 = vadd.f32 %v1811_v20, %v1678_v13 }
 0x75e   :  { %v1895_v52 = vadd.f32 %v1893_v35, %v1813_v25 }
 0x75f   :  { %v2166_v43 = vmul.f32 -1.442695, %v1885_v0 }
 0x760   :  { %v2167_v62 = vmul.f32 -1.442695, %v1895_v52 }
 0x761   :  { %3209 = vpow2.f32 %v2166_v43 }
 0x762   :  { %3211 = vpow2.f32 %v2167_v62 }
 0x76b   :  { %v3210_v15 = vpop.eup %3209 }
 0x76c   :  { %v1889_v18 = vadd.f32 1.0, %v3210_v15  ;;  %v3212_v40 = vpop.eup %3211 }
 0x76d   :  { %v1899_v28 = vadd.f32 1.0, %v3212_v40 }
 0x76e   :  { %3213 = vrcp.f32 %v1889_v18 }
 0x76f   :  { %3215 = vrcp.f32 %v1899_v28 }
 0x778   :  { %v3214_v16 = vpop.eup %3213 }
 0x779   :  { %v1902_v3 = vmul.f32 %v3214_v16, %v1882_v63  ;;  %v3216_v45 = vpop.eup %3215 }
 0x77a   :  { %v1907_v46 = vsub.f32 1.0, %v3216_v45  ;;  %v1909_v54 = vmul.f32 %v3216_v45, %v3801_v42 }
 0x77b   :  { %v1905_v17 = vadd.f32 %v1903_v14, %v1902_v3 }
 0x77d   :  { %3217 = vtanh.f32 %v1905_v17 }
 0x787   :  { %v3218_v48 = vpop.eup %3217 }
 0x788   :  { %v1908_v51 = vmul.f32 %v3218_v48, %v1907_v46 }
 0x78a   :  { %v1910_v56 = vadd.f32 %v1909_v54, %v1908_v51 }
 0x78c   :  { %1911 = vst [vmem:[%s3867_s6 + $0x6] sm:$0x1] %v1910_v56  ;;  %2044 = vmatmul.mubr.f32.vlgmr.msra.gmra.mrb[16].mxu0 %v1910_v56  ;;  %2636 = vmatmul.mubr.f32.vlgmr.msra.gmra.mrb[16].mxu1 %v1910_v56 }
 0x85f   :  { %v2045_v49 = vpop.f32.mrb[16].mxu0  ;;  %v2116_v7 = vpop.f32.mrb[16].mxu1 }
 0x860   :  { %v2046_v12 = vadd.f32 %v2045_v49, %v1967_v58  ;;  %v2047_v21 = vpop.f32.mrb[17].mxu0  ;;  %v2637_v22 = vpop.f32.mrb[17].mxu1  ;;  %v2117_v44 = vadd.f32 %v2116_v7, %v1975_v37 }
 0x861   :  { %v2048_v29 = vadd.f32 %v2047_v21, %v1971_v5 }
 0x862   :  { %v2120_v36 = vadd.f32 %v2046_v12, %v1913_v10 }
 0x863   :  { %v2130_v23 = vadd.f32 %v2128_v55, %v2048_v29 }
 0x864   :  { %v2168_v39 = vmul.f32 -1.442695, %v2120_v36 }
 0x865   :  { %v2169_v26 = vmul.f32 -1.442695, %v2130_v23 }
 0x866   :  { %3219 = vpow2.f32 %v2168_v39 }
 0x867   :  { %3221 = vpow2.f32 %v2169_v26 }
 0x870   :  { %v3220_v32 = vpop.eup %3219 }
 0x871   :  { %v2124_v34 = vadd.f32 1.0, %v3220_v32  ;;  %v3222_v31 = vpop.eup %3221 }
 0x872   :  { %v2134_v41 = vadd.f32 1.0, %v3222_v31 }
 0x873   :  { %3223 = vrcp.f32 %v2124_v34 }
 0x874   :  { %3225 = vrcp.f32 %v2134_v41 }
 0x87d   :  { %v3224_v50 = vpop.eup %3223 }
 0x87e   :  { %v2137_v53 = vmul.f32 %v3224_v50, %v2117_v44  ;;  %v3226_v6 = vpop.eup %3225 }
 0x87f   :  { %v2142_v8 = vsub.f32 1.0, %v3226_v6  ;;  %v2144_v24 = vmul.f32 %v3226_v6, %v1910_v56 }
 0x880   :  { %v2140_v61 = vadd.f32 %v2138_v59, %v2137_v53 }
 0x882   :  { %3227 = vtanh.f32 %v2140_v61 }
 0x88c   :  { %v3228_v9 = vpop.eup %3227 }
 0x88d   :  { %v2143_v19 = vmul.f32 %v3228_v9, %v2142_v8 }
 0x88f   :  { %v2145_v27 = vadd.f32 %v2144_v24, %v2143_v19 }
 0x891   :  { %2146 = vst [vmem:[%s3867_s6 + $0x7] sm:$0x1] %v2145_v27  ;;  %2147 = vst [vmem:[#allocation2] sm:$0x1] %v2145_v27 }
 0x892   :  { %2152 = vsyncpa [#allocation5], 1 }
 0x893   :  { %2153 = vsyncpa [#allocation7], 1 }

</bundles_post_ra>
